<compile_context>
chip_gen: v7x
topology: tpu7x:2x2x1
jax: 0.10.0
libtpu: 0.0.40
codegen_flags: <defaults>
</compile_context>

<pallas_src>
import math
from functools import partial

import jax
import jax.numpy as jnp
from jax.experimental import pallas as pl
from jax.experimental.pallas import tpu as pltpu

LANE = 128


def _round_up(v, m):
    return ((v + m - 1) // m) * m


def _convbr_kernel(x_ref, w_ref, b_ref, o_ref, *, kh, kw, sh, sw, dh, dw,
                   ho, wo, cinp, tc):
    # x_ref: (Hp, Wp, Cinp)      w_ref: (kh*kw, Cinp, tc)
    # b_ref: (1, tc)             o_ref: (Ho, Wo, tc)
    m = ho * wo
    # Initialise the accumulator with the folded-BN bias: saves a separate
    # VPU add pass over the full (M, tc) tile in the epilogue.
    acc = jnp.broadcast_to(b_ref[...], (m, tc)).astype(jnp.float32)
    for dy in range(kh):                        # static unrolled tap loop
        for dx in range(kw):
            y0, x0 = dy * dh, dx * dw
            if sh == 1 and sw == 1:
                tap = x_ref[y0:y0 + ho, x0:x0 + wo, :]
            else:
                # TODO(synk): stride>1 uses a value-level strided slice; it is
                # semantically correct but not exercised by the stride=1 demo.
                win = x_ref[y0:y0 + (ho - 1) * sh + 1,
                            x0:x0 + (wo - 1) * sw + 1, :]
                tap = win[::sh, ::sw, :]
            acc = acc + jnp.dot(tap.reshape(m, cinp),
                                w_ref[dy * kw + dx],
                                preferred_element_type=jnp.float32)
    y = jnp.maximum(acc, 0.0)
    o_ref[...] = y.reshape(ho, wo, tc).astype(o_ref.dtype)


def convbr_forward(w, scale, bias, x, *, stride=1, padding=0, dilation=1,
                   compute_dtype=jnp.float32):
    """ConvBR forward: Conv2d(bias=False) + folded BatchNorm2d + ReLU.

    w:     (Cout, Cin, kh, kw)  PyTorch OIHW conv weight
    scale: (Cout,)              folded BN scale  (gamma / sqrt(var + eps))
    bias:  (Cout,)              folded BN bias   (beta - mean * scale)
    x:     (N, Cin, H, W)       NCHW, like the PyTorch module
    returns (N, Cout, Ho, Wo) float32
    """
    n, cin, h, wd = x.shape
    cout, _, kh, kw = w.shape
    sh = sw = int(stride)
    ph = pw = int(padding)
    dh = dw = int(dilation)

    ho = (h + 2 * ph - dh * (kh - 1) - 1) // sh + 1
    wo = (wd + 2 * pw - dw * (kw - 1) - 1) // sw + 1

    cinp = _round_up(cin, LANE)        # lane-dense K for every tap matmul
    coutp = _round_up(cout, LANE)      # lane-dense output -> unmasked full vst
    tc = 256 if coutp % 256 == 0 else 128   # per-step Cout tile (VMEM bound)
    n_ct = coutp // tc

    # NHWC + spatial halo + channel pad in ONE host pad (no im2col slab,
    # no M-row padding, no extra HBM round trips).
    x_nhwc = jnp.transpose(x, (0, 2, 3, 1))
    x_p = jnp.pad(x_nhwc, ((0, 0), (ph, ph), (pw, pw), (0, cinp - cin)))
    x_p = x_p.astype(compute_dtype)
    hp, wp = h + 2 * ph, wd + 2 * pw

    # Fold BN scale into the weight; kernel epilogue becomes just bias + relu.
    w_f = w.astype(jnp.float32) * scale[:, None, None, None]
    # OIHW -> (kh*kw, Cin, Cout), then zero-pad Cin/Cout to lane multiples
    # (zero pad columns produce y=0, bias pad is 0, relu(0)=0, sliced off).
    w_t = jnp.transpose(w_f, (2, 3, 1, 0)).reshape(kh * kw, cin, cout)
    w_p = jnp.pad(w_t, ((0, 0), (0, cinp - cin), (0, coutp - cout)))
    w_p = w_p.astype(compute_dtype)
    b_p = jnp.pad(bias.astype(jnp.float32), (0, coutp - cout)).reshape(1, coutp)

    kernel = partial(_convbr_kernel, kh=kh, kw=kw, sh=sh, sw=sw, dh=dh, dw=dw,
                     ho=ho, wo=wo, cinp=cinp, tc=tc)

    out = pl.pallas_call(
        kernel,
        out_shape=jax.ShapeDtypeStruct((n, ho, wo, coutp), jnp.float32),
        grid=(n, n_ct),
        in_specs=[
            # Image (with halo): reused across the Cout-tile axis -> one DMA/image.
            pl.BlockSpec((None, hp, wp, cinp), lambda i, j: (i, 0, 0, 0)),
            # Folded weight: only the current Cout tile is resident.
            pl.BlockSpec((kh * kw, cinp, tc), lambda i, j: (0, 0, j)),
            # Folded bias tile.
            pl.BlockSpec((1, tc), lambda i, j: (0, j)),
        ],
        out_specs=pl.BlockSpec((None, ho, wo, tc), lambda i, j: (i, 0, 0, j)),
        compiler_params=pltpu.CompilerParams(
            dimension_semantics=("parallel", "parallel")),
    )(x_p, w_p, b_p)

    out = out[..., :cout]                     # drop channel padding
    return jnp.transpose(out, (0, 3, 1, 2))   # back to NCHW


def convbr_reference(w, scale, bias, x, *, stride=1, padding=0, dilation=1):
    """Pure-JAX reference (conv + folded BN + relu) for correctness checking."""
    y = jax.lax.conv_general_dilated(
        x, w,
        window_strides=(stride, stride),
        padding=((padding, padding), (padding, padding)),
        rhs_dilation=(dilation, dilation),
        dimension_numbers=("NCHW", "OIHW", "NCHW"))
    y = y * scale[None, :, None, None] + bias[None, :, None, None]
    return jnp.maximum(y, 0.0)


def init_convbr_params(key, cin, cout, ksize):
    # nn.init.kaiming_normal_(weight, a=1): gain = sqrt(2/(1+1^2)) = 1,
    # fan_in = cin*k*k  ->  std = 1/sqrt(cin*k*k).  Conv has bias=False.
    std = 1.0 / math.sqrt(cin * ksize * ksize)
    w = std * jax.random.normal(key, (cout, cin, ksize, ksize), jnp.float32)
    # BatchNorm2d folded in inference mode with default (fresh) statistics.
    gamma = jnp.ones((cout,), jnp.float32)
    beta = jnp.zeros((cout,), jnp.float32)
    mean = jnp.zeros((cout,), jnp.float32)
    var = jnp.ones((cout,), jnp.float32)
    scale = gamma / jnp.sqrt(var + 1e-5)
    bias = beta - mean * scale
    return w, scale, bias


if __name__ == "__main__":
    key = jax.random.PRNGKey(0)
    N, CIN, COUT, H, W = 2, 4, 8, 16, 16
    KSIZE, STRIDE, PAD, DIL = 3, 1, 1, 1

    kparam, kx = jax.random.split(key)
    w, scale, bias = init_convbr_params(kparam, CIN, COUT, KSIZE)
    x = jax.random.normal(kx, (N, CIN, H, W), jnp.float32)

    fwd = jax.jit(partial(convbr_forward,
                          stride=STRIDE, padding=PAD, dilation=DIL,
                          compute_dtype=jnp.float32))
    out = fwd(w, scale, bias, x)
    jax.block_until_ready(out)

    assert out.shape == (N, COUT, H, W), out.shape
    assert out.dtype == jnp.float32
    assert bool(jnp.all(jnp.isfinite(out)))

    ref = convbr_reference(w, scale, bias, x,
                           stride=STRIDE, padding=PAD, dilation=DIL)
    err = float(jnp.max(jnp.abs(out - ref)))
    assert bool(jnp.allclose(out, ref, atol=1e-4, rtol=1e-4)), err

    print("KERNEL_OK")
</pallas_src>

<mosaic_0001>
module attributes {stable_mosaic.version = 11 : i64} {
  func.func @_convbr_kernel(%arg0: i32, %arg1: i32, %arg2: memref<1x18x18x128xf32, #tpu.memory_space<vmem>>, %arg3: memref<9x128x128xf32, #tpu.memory_space<vmem>>, %arg4: memref<1x128xf32, #tpu.memory_space<vmem>>, %arg5: memref<1x16x16x128xf32, #tpu.memory_space<vmem>>) attributes {dimension_semantics = [#tpu.dimension_semantics<parallel>, #tpu.dimension_semantics<parallel>], iteration_bounds = array<i64: 2, 1>, scalar_prefetch = 0 : i64, scratch_operands = 0 : i64, tpu.core_type = #tpu.core_type<tc>, window_params = [{transform_indices = @transform_0, window_bounds = array<i64: 1, 18, 18, 128>}, {transform_indices = @transform_1, window_bounds = array<i64: 9, 128, 128>}, {transform_indices = @transform_2, window_bounds = array<i64: 1, 128>}, {transform_indices = @transform_3, window_bounds = array<i64: 1, 16, 16, 128>}]} {
    %c0 = arith.constant 0 : index
    %c0_0 = arith.constant 0 : index
    %0 = vector.load %arg4[%c0, %c0_0] : memref<1x128xf32, #tpu.memory_space<vmem>>, vector<1x128xf32>
    %1 = vector.shape_cast %0 : vector<1x128xf32> to vector<1x128xf32>
    %2 = vector.broadcast %1 : vector<1x128xf32> to vector<256x128xf32>
    %c0_1 = arith.constant 0 : index
    %c0_2 = arith.constant 0 : index
    %c0_3 = arith.constant 0 : index
    %c0_4 = arith.constant 0 : index
    %3 = vector.load %arg2[%c0_1, %c0_2, %c0_3, %c0_4] : memref<1x18x18x128xf32, #tpu.memory_space<vmem>>, vector<1x16x16x128xf32>
    %4 = vector.shape_cast %3 : vector<1x16x16x128xf32> to vector<16x16x128xf32>
    %5 = vector.shape_cast %4 : vector<16x16x128xf32> to vector<256x128xf32>
    %c0_5 = arith.constant 0 : index
    %c0_6 = arith.constant 0 : index
    %c0_7 = arith.constant 0 : index
    %6 = vector.load %arg3[%c0_5, %c0_6, %c0_7] : memref<9x128x128xf32, #tpu.memory_space<vmem>>, vector<1x128x128xf32>
    %7 = vector.shape_cast %6 : vector<1x128x128xf32> to vector<128x128xf32>
    %cst = arith.constant dense<0.000000e+00> : vector<256x128xf32>
    %8 = tpu.matmul %5, %7, %cst {dimension_numbers = #tpu.dot_dimension_numbers<[1], [0], [0], [1], [0, 0, 1, 1], [], []>} : vector<256x128xf32>, vector<128x128xf32>, vector<256x128xf32> -> vector<256x128xf32>
    %9 = arith.addf %2, %8 : vector<256x128xf32>
    %c0_8 = arith.constant 0 : index
    %c0_9 = arith.constant 0 : index
    %c1 = arith.constant 1 : index
    %c0_10 = arith.constant 0 : index
    %10 = vector.load %arg2[%c0_8, %c0_9, %c1, %c0_10] : memref<1x18x18x128xf32, #tpu.memory_space<vmem>>, vector<1x16x16x128xf32>
    %11 = vector.shape_cast %10 : vector<1x16x16x128xf32> to vector<16x16x128xf32>
    %12 = vector.shape_cast %11 : vector<16x16x128xf32> to vector<256x128xf32>
    %c1_11 = arith.constant 1 : index
    %c0_12 = arith.constant 0 : index
    %c0_13 = arith.constant 0 : index
    %13 = vector.load %arg3[%c1_11, %c0_12, %c0_13] : memref<9x128x128xf32, #tpu.memory_space<vmem>>, vector<1x128x128xf32>
    %14 = vector.shape_cast %13 : vector<1x128x128xf32> to vector<128x128xf32>
    %cst_14 = arith.constant dense<0.000000e+00> : vector<256x128xf32>
    %15 = tpu.matmul %12, %14, %cst_14 {dimension_numbers = #tpu.dot_dimension_numbers<[1], [0], [0], [1], [0, 0, 1, 1], [], []>} : vector<256x128xf32>, vector<128x128xf32>, vector<256x128xf32> -> vector<256x128xf32>
    %16 = arith.addf %9, %15 : vector<256x128xf32>
    %c0_15 = arith.constant 0 : index
    %c0_16 = arith.constant 0 : index
    %c2 = arith.constant 2 : index
    %c0_17 = arith.constant 0 : index
    %17 = vector.load %arg2[%c0_15, %c0_16, %c2, %c0_17] : memref<1x18x18x128xf32, #tpu.memory_space<vmem>>, vector<1x16x16x128xf32>
    %18 = vector.shape_cast %17 : vector<1x16x16x128xf32> to vector<16x16x128xf32>
    %19 = vector.shape_cast %18 : vector<16x16x128xf32> to vector<256x128xf32>
    %c2_18 = arith.constant 2 : index
    %c0_19 = arith.constant 0 : index
    %c0_20 = arith.constant 0 : index
    %20 = vector.load %arg3[%c2_18, %c0_19, %c0_20] : memref<9x128x128xf32, #tpu.memory_space<vmem>>, vector<1x128x128xf32>
    %21 = vector.shape_cast %20 : vector<1x128x128xf32> to vector<128x128xf32>
    %cst_21 = arith.constant dense<0.000000e+00> : vector<256x128xf32>
    %22 = tpu.matmul %19, %21, %cst_21 {dimension_numbers = #tpu.dot_dimension_numbers<[1], [0], [0], [1], [0, 0, 1, 1], [], []>} : vector<256x128xf32>, vector<128x128xf32>, vector<256x128xf32> -> vector<256x128xf32>
    %23 = arith.addf %16, %22 : vector<256x128xf32>
    %c0_22 = arith.constant 0 : index
    %c1_23 = arith.constant 1 : index
    %c0_24 = arith.constant 0 : index
    %c0_25 = arith.constant 0 : index
    %24 = vector.load %arg2[%c0_22, %c1_23, %c0_24, %c0_25] : memref<1x18x18x128xf32, #tpu.memory_space<vmem>>, vector<1x16x16x128xf32>
    %25 = vector.shape_cast %24 : vector<1x16x16x128xf32> to vector<16x16x128xf32>
    %26 = vector.shape_cast %25 : vector<16x16x128xf32> to vector<256x128xf32>
    %c3 = arith.constant 3 : index
    %c0_26 = arith.constant 0 : index
    %c0_27 = arith.constant 0 : index
    %27 = vector.load %arg3[%c3, %c0_26, %c0_27] : memref<9x128x128xf32, #tpu.memory_space<vmem>>, vector<1x128x128xf32>
    %28 = vector.shape_cast %27 : vector<1x128x128xf32> to vector<128x128xf32>
    %cst_28 = arith.constant dense<0.000000e+00> : vector<256x128xf32>
    %29 = tpu.matmul %26, %28, %cst_28 {dimension_numbers = #tpu.dot_dimension_numbers<[1], [0], [0], [1], [0, 0, 1, 1], [], []>} : vector<256x128xf32>, vector<128x128xf32>, vector<256x128xf32> -> vector<256x128xf32>
    %30 = arith.addf %23, %29 : vector<256x128xf32>
    %c0_29 = arith.constant 0 : index
    %c1_30 = arith.constant 1 : index
    %c1_31 = arith.constant 1 : index
    %c0_32 = arith.constant 0 : index
    %31 = vector.load %arg2[%c0_29, %c1_30, %c1_31, %c0_32] : memref<1x18x18x128xf32, #tpu.memory_space<vmem>>, vector<1x16x16x128xf32>
    %32 = vector.shape_cast %31 : vector<1x16x16x128xf32> to vector<16x16x128xf32>
    %33 = vector.shape_cast %32 : vector<16x16x128xf32> to vector<256x128xf32>
    %c4 = arith.constant 4 : index
    %c0_33 = arith.constant 0 : index
    %c0_34 = arith.constant 0 : index
    %34 = vector.load %arg3[%c4, %c0_33, %c0_34] : memref<9x128x128xf32, #tpu.memory_space<vmem>>, vector<1x128x128xf32>
    %35 = vector.shape_cast %34 : vector<1x128x128xf32> to vector<128x128xf32>
    %cst_35 = arith.constant dense<0.000000e+00> : vector<256x128xf32>
    %36 = tpu.matmul %33, %35, %cst_35 {dimension_numbers = #tpu.dot_dimension_numbers<[1], [0], [0], [1], [0, 0, 1, 1], [], []>} : vector<256x128xf32>, vector<128x128xf32>, vector<256x128xf32> -> vector<256x128xf32>
    %37 = arith.addf %30, %36 : vector<256x128xf32>
    %c0_36 = arith.constant 0 : index
    %c1_37 = arith.constant 1 : index
    %c2_38 = arith.constant 2 : index
    %c0_39 = arith.constant 0 : index
    %38 = vector.load %arg2[%c0_36, %c1_37, %c2_38, %c0_39] : memref<1x18x18x128xf32, #tpu.memory_space<vmem>>, vector<1x16x16x128xf32>
    %39 = vector.shape_cast %38 : vector<1x16x16x128xf32> to vector<16x16x128xf32>
    %40 = vector.shape_cast %39 : vector<16x16x128xf32> to vector<256x128xf32>
    %c5 = arith.constant 5 : index
    %c0_40 = arith.constant 0 : index
    %c0_41 = arith.constant 0 : index
    %41 = vector.load %arg3[%c5, %c0_40, %c0_41] : memref<9x128x128xf32, #tpu.memory_space<vmem>>, vector<1x128x128xf32>
    %42 = vector.shape_cast %41 : vector<1x128x128xf32> to vector<128x128xf32>
    %cst_42 = arith.constant dense<0.000000e+00> : vector<256x128xf32>
    %43 = tpu.matmul %40, %42, %cst_42 {dimension_numbers = #tpu.dot_dimension_numbers<[1], [0], [0], [1], [0, 0, 1, 1], [], []>} : vector<256x128xf32>, vector<128x128xf32>, vector<256x128xf32> -> vector<256x128xf32>
    %44 = arith.addf %37, %43 : vector<256x128xf32>
    %c0_43 = arith.constant 0 : index
    %c2_44 = arith.constant 2 : index
    %c0_45 = arith.constant 0 : index
    %c0_46 = arith.constant 0 : index
    %45 = vector.load %arg2[%c0_43, %c2_44, %c0_45, %c0_46] : memref<1x18x18x128xf32, #tpu.memory_space<vmem>>, vector<1x16x16x128xf32>
    %46 = vector.shape_cast %45 : vector<1x16x16x128xf32> to vector<16x16x128xf32>
    %47 = vector.shape_cast %46 : vector<16x16x128xf32> to vector<256x128xf32>
    %c6 = arith.constant 6 : index
    %c0_47 = arith.constant 0 : index
    %c0_48 = arith.constant 0 : index
    %48 = vector.load %arg3[%c6, %c0_47, %c0_48] : memref<9x128x128xf32, #tpu.memory_space<vmem>>, vector<1x128x128xf32>
    %49 = vector.shape_cast %48 : vector<1x128x128xf32> to vector<128x128xf32>
    %cst_49 = arith.constant dense<0.000000e+00> : vector<256x128xf32>
    %50 = tpu.matmul %47, %49, %cst_49 {dimension_numbers = #tpu.dot_dimension_numbers<[1], [0], [0], [1], [0, 0, 1, 1], [], []>} : vector<256x128xf32>, vector<128x128xf32>, vector<256x128xf32> -> vector<256x128xf32>
    %51 = arith.addf %44, %50 : vector<256x128xf32>
    %c0_50 = arith.constant 0 : index
    %c2_51 = arith.constant 2 : index
    %c1_52 = arith.constant 1 : index
    %c0_53 = arith.constant 0 : index
    %52 = vector.load %arg2[%c0_50, %c2_51, %c1_52, %c0_53] : memref<1x18x18x128xf32, #tpu.memory_space<vmem>>, vector<1x16x16x128xf32>
    %53 = vector.shape_cast %52 : vector<1x16x16x128xf32> to vector<16x16x128xf32>
    %54 = vector.shape_cast %53 : vector<16x16x128xf32> to vector<256x128xf32>
    %c7 = arith.constant 7 : index
    %c0_54 = arith.constant 0 : index
    %c0_55 = arith.constant 0 : index
    %55 = vector.load %arg3[%c7, %c0_54, %c0_55] : memref<9x128x128xf32, #tpu.memory_space<vmem>>, vector<1x128x128xf32>
    %56 = vector.shape_cast %55 : vector<1x128x128xf32> to vector<128x128xf32>
    %cst_56 = arith.constant dense<0.000000e+00> : vector<256x128xf32>
    %57 = tpu.matmul %54, %56, %cst_56 {dimension_numbers = #tpu.dot_dimension_numbers<[1], [0], [0], [1], [0, 0, 1, 1], [], []>} : vector<256x128xf32>, vector<128x128xf32>, vector<256x128xf32> -> vector<256x128xf32>
    %58 = arith.addf %51, %57 : vector<256x128xf32>
    %c0_57 = arith.constant 0 : index
    %c2_58 = arith.constant 2 : index
    %c2_59 = arith.constant 2 : index
    %c0_60 = arith.constant 0 : index
    %59 = vector.load %arg2[%c0_57, %c2_58, %c2_59, %c0_60] : memref<1x18x18x128xf32, #tpu.memory_space<vmem>>, vector<1x16x16x128xf32>
    %60 = vector.shape_cast %59 : vector<1x16x16x128xf32> to vector<16x16x128xf32>
    %61 = vector.shape_cast %60 : vector<16x16x128xf32> to vector<256x128xf32>
    %c8 = arith.constant 8 : index
    %c0_61 = arith.constant 0 : index
    %c0_62 = arith.constant 0 : index
    %62 = vector.load %arg3[%c8, %c0_61, %c0_62] : memref<9x128x128xf32, #tpu.memory_space<vmem>>, vector<1x128x128xf32>
    %63 = vector.shape_cast %62 : vector<1x128x128xf32> to vector<128x128xf32>
    %cst_63 = arith.constant dense<0.000000e+00> : vector<256x128xf32>
    %64 = tpu.matmul %61, %63, %cst_63 {dimension_numbers = #tpu.dot_dimension_numbers<[1], [0], [0], [1], [0, 0, 1, 1], [], []>} : vector<256x128xf32>, vector<128x128xf32>, vector<256x128xf32> -> vector<256x128xf32>
    %65 = arith.addf %58, %64 : vector<256x128xf32>
    %cst_64 = arith.constant 0.000000e+00 : f32
    %66 = vector.broadcast %cst_64 : f32 to vector<256x128xf32>
    %67 = arith.maximumf %65, %66 : vector<256x128xf32>
    %68 = vector.shape_cast %67 : vector<256x128xf32> to vector<16x16x128xf32>
    %c0_65 = arith.constant 0 : index
    %c0_66 = arith.constant 0 : index
    %c0_67 = arith.constant 0 : index
    %c0_68 = arith.constant 0 : index
    %69 = vector.load %arg5[%c0_65, %c0_66, %c0_67, %c0_68] : memref<1x16x16x128xf32, #tpu.memory_space<vmem>>, vector<1x16x16x128xf32>
    %70 = vector.shape_cast %69 : vector<1x16x16x128xf32> to vector<16x16x128xf32>
    %71 = vector.shape_cast %68 : vector<16x16x128xf32> to vector<1x16x16x128xf32>
    tpu.vector_store %arg5[%c0_65, %c0_66, %c0_67, %c0_68], %71 {strides = array<i32>} : memref<1x16x16x128xf32, #tpu.memory_space<vmem>>, vector<1x16x16x128xf32>,
    return
  }
  func.func @transform_0(%arg0: i32, %arg1: i32) -> (i32, i32, i32, i32) {
    %c0_i32 = arith.constant 0 : i32
    %c0_i32_0 = arith.constant 0 : i32
    %c0_i32_1 = arith.constant 0 : i32
    %c0_i32_2 = arith.constant 0 : i32
    return %arg0, %c0_i32, %c0_i32_0, %c0_i32_1 : i32, i32, i32, i32
  }
  func.func @transform_1(%arg0: i32, %arg1: i32) -> (i32, i32, i32) {
    %c0_i32 = arith.constant 0 : i32
    %c0_i32_0 = arith.constant 0 : i32
    %c0_i32_1 = arith.constant 0 : i32
    return %c0_i32, %c0_i32_0, %arg1 : i32, i32, i32
  }
  func.func @transform_2(%arg0: i32, %arg1: i32) -> (i32, i32) {
    %c0_i32 = arith.constant 0 : i32
    %c0_i32_0 = arith.constant 0 : i32
    return %c0_i32, %arg1 : i32, i32
  }
  func.func @transform_3(%arg0: i32, %arg1: i32) -> (i32, i32, i32, i32) {
    %c0_i32 = arith.constant 0 : i32
    %c0_i32_0 = arith.constant 0 : i32
    %c0_i32_1 = arith.constant 0 : i32
    return %arg0, %c0_i32, %c0_i32_0, %arg1 : i32, i32, i32, i32
  }
}

</mosaic_0001>

<bundles_post_ra>
// kernel: convbr_forward.1
= control target key start
LH: loop header
LB: loop body
LE: loop exit
PB: predicated region body
PF: predicated region fallthrough
CT: control target
= control target key end

     0   :  { %s5300_s12 = smov 0   ;;  %s5302_s13 = smov 0   ;;  %s6482_s0 = inlined_call_operand.vmem [shape: f32[2,18,18,128], index: 0, kind: input, shape index: {}]   ;;  %s6483_s1 = inlined_call_operand.vmem [shape: f32[9,128,128], index: 1, kind: input, shape index: {}]   ;;  %s6484_s2 = inlined_call_operand.vmem [shape: f32[1,128], index: 2, kind: input, shape index: {}]   ;;  %s6485_s3 = inlined_call_operand.vmem [shape: f32[2,16,16,128], index: 3, kind: output, shape index: {}]  }
   0x1   :  { %s5304_s14 = smov 0  }
   0x2 LB: > { %s25_s15 = sadd.s32 1, %s5274_s13  ;;  %p3159_p0 = scmp.ge.s32.totalorder %s5278_s14, 1  ;;  %s5278_s14 = sphi %s5304_s14, %s13_s14   ;;  %s5274_s13 = sphi %s5302_s13, %s6546_s13   ;;  %s5270_s12 = sphi %s5300_s12, %s6545_s12  }
   0x3   : > { %p27_p1 = scmp.ge.s32.totalorder %s25_s15, 2  ;;  %p168_p2 = scmp.lt.s32.totalorder %s5278_s14, 3 }
   0x5   : > { %s6548_s15 = smov (%p27_p1, %s25_s15), 0  ;;  %p169_p3 = pnand %p3159_p0, %p168_p2 }
   0x7   : > { %172 = sbr.rel (%p169_p3) target bundleno = 553 (0x229), region = 32 }
   0xe   : > { %v261_v0 = vld [vmem:[%s6483_s1] sm:$0xff]  ;;  %v262_v1 = vld [vmem:[%s6483_s1 + $0x8] sm:$0xff]  ;;  %p202_p4 = scmp.lt.s32.totalorder %s5270_s12, 1  ;;  %v263_v5 = vld [vmem:[%s6483_s1 + $0x10] sm:$0xff] }
   0xf   : > { %v3276_v2 = vld [vmem:[%s6483_s1 + $0x200] sm:$0xff]  ;;  %v4639_v3 = vpack.c.bf16 %v262_v1, %v261_v0  ;;  %v3277_v4 = vld [vmem:[%s6483_s1 + $0x208] sm:$0xff]  ;;  %v264_v6 = vld [vmem:[%s6483_s1 + $0x18] sm:$0xff] }
  0x10   : > { %v5336_v7 = vpack.c.bf16 %v3277_v4, %v3276_v2  ;;  %v4643_v8 = vpack.c.bf16 %v264_v6, %v263_v5  ;;  %v3278_v9 = vld [vmem:[%s6483_s1 + $0x210] sm:$0xff]  ;;  %v3279_v10 = vld [vmem:[%s6483_s1 + $0x218] sm:$0xff]  ;;  %v265_v11 = vld [vmem:[%s6483_s1 + $0x20] sm:$0xff]  ;;  %s6550_s12 = smov (!%p202_p4, %s5270_s12), 1 }
  0x11   : > { %4640 = vmatprep.subr.bf16.mxu1 %v4639_v3  ;;  %v5349_v12 = vpack.c.bf16 %v3279_v10, %v3278_v9  ;;  %v266_v13 = vld [vmem:[%s6483_s1 + $0x28] sm:$0xff]  ;;  %v3280_v14 = vld [vmem:[%s6483_s1 + $0x220] sm:$0xff]  ;;  %s5231_s17 = smul.u32 432, %s6550_s12  ;;  %v267_v18 = vld [vmem:[%s6483_s1 + $0x30] sm:$0xff]  ;;  %s3486_s21 = sshll.u32 %s6550_s12, 8 }
  0x12   : > { %6511 = vst [vmem:[#allocation2_spill] sm:$0xff] %v5336_v7  ;;  %v3281_v15 = vld [vmem:[%s6483_s1 + $0x228] sm:$0xff]  ;;  %4768 = vmatprep.subr.bf16.mxu0 %v5336_v7  ;;  %4642 = vmatpush3.bf16.msra.mxu1 %v4639_v3  ;;  %v4647_v16 = vpack.c.bf16 %v266_v13, %v265_v11  ;;  %v268_v19 = vld [vmem:[%s6483_s1 + $0x38] sm:$0xff]  ;;  %v3282_v20 = vld [vmem:[%s6483_s1 + $0x230] sm:$0xff]  ;;  %s6405_s24 = scalar_lea.vmem %s6485_s3, %s3486_s21 }
  0x13   : > { %6512 = vst [vmem:[#allocation3_spill] sm:$0xff] %v5349_v12  ;;  %4770 = vmatpush3.bf16.msra.mxu0 %v5336_v7  ;;  %4644 = vmatprep.subr.bf16.mxu1 %v4643_v8  ;;  %v5364_v17 = vpack.c.bf16 %v3281_v15, %v3280_v14  ;;  %v3283_v21 = vld [vmem:[%s6483_s1 + $0x238] sm:$0xff]  ;;  %s5381_s28 = scalar_lea.vmem %s6482_s0, %s5231_s17  ;;  %v4651_v22 = vpack.c.bf16 %v268_v19, %v267_v18  ;;  %v269_v24 = vld [vmem:[%s6483_s1 + $0x40] sm:$0xff]  ;;  %v270_v25 = vld [vmem:[%s6483_s1 + $0x48] sm:$0xff] }
  0x14   : > { %4772 = vmatprep.subr.bf16.mxu0 %v5349_v12  ;;  %v5385_v23 = vpack.c.bf16 %v3283_v21, %v3282_v20  ;;  %v229_v26 = vld [vmem:[%s5381_s28] sm:$0xff]  ;;  %v3285_v28 = vld [vmem:[%s6483_s1 + $0x248] sm:$0xff]  ;;  %v4655_v30 = vpack.c.bf16 %v270_v25, %v269_v24  ;;  %v271_v32 = vld [vmem:[%s6483_s1 + $0x50] sm:$0xff] }
  0x15   : > { %6513 = vst [vmem:[#allocation4_spill] sm:$0xff] %v5364_v17  ;;  %v3284_v27 = vld [vmem:[%s6483_s1 + $0x240] sm:$0xff]  ;;  %3951 = vmatprep.mubr.f32.mxu1 %v229_v26  ;;  %v272_v33 = vld [vmem:[%s6483_s1 + $0x58] sm:$0xff]  ;;  %v3286_v34 = vld [vmem:[%s6483_s1 + $0x250] sm:$0xff] }
  0x16   : > { %4646 = vmatpush3.bf16.msra.mxu1 %v4643_v8  ;;  %6514 = vst [vmem:[#allocation5_spill] sm:$0xff] %v5385_v23  ;;  %v5401_v29 = vld [vmem:[%s5381_s28 + $0x19] sm:$0xff]  ;;  %v5406_v31 = vpack.c.bf16 %v3285_v28, %v3284_v27  ;;  %v4659_v36 = vpack.c.bf16 %v272_v33, %v271_v32  ;;  %v274_v39 = vld [vmem:[%s6483_s1 + $0x68] sm:$0xff]  ;;  %v275_v44 = vld [vmem:[%s6483_s1 + $0x70] sm:$0xff] }
  0x17   : > { %4774 = vmatpush3.bf16.msra.mxu0 %v5349_v12  ;;  %4648 = vmatprep.subr.bf16.mxu1 %v4647_v16  ;;  %v3287_v35 = vld [vmem:[%s6483_s1 + $0x258] sm:$0xff]  ;;  %v273_v38 = vld [vmem:[%s6483_s1 + $0x60] sm:$0xff]  ;;  %v3289_v41 = vld [vmem:[%s6483_s1 + $0x268] sm:$0xff] }
  0x18   : > { %4776 = vmatprep.subr.bf16.mxu0 %v5364_v17  ;;  %4271 = vmatprep.mubr.f32.mxu0 %v5401_v29  ;;  %6515 = vst [vmem:[#allocation6_spill] sm:$0xff] %v5406_v31  ;;  %v5422_v37 = vpack.c.bf16 %v3287_v35, %v3286_v34  ;;  %v3288_v40 = vld [vmem:[%s6483_s1 + $0x260] sm:$0xff]  ;;  %v4663_v42 = vpack.c.bf16 %v274_v39, %v273_v38  ;;  %v276_v45 = vld [vmem:[%s6483_s1 + $0x78] sm:$0xff]  ;;  %v3290_v46 = vld [vmem:[%s6483_s1 + $0x270] sm:$0xff] }
  0x19   : > { %v5438_v43 = vpack.c.bf16 %v3289_v41, %v3288_v40  ;;  %v3291_v47 = vld [vmem:[%s6483_s1 + $0x278] sm:$0xff]  ;;  %v4667_v48 = vpack.c.bf16 %v276_v45, %v275_v44  ;;  %v3164_v50 = vld [vmem:[%s6483_s1 + $0x80] sm:$0xff]  ;;  %v3165_v51 = vld [vmem:[%s6483_s1 + $0x88] sm:$0xff] }
  0x1a   : > { %4650 = vmatpush3.bf16.msra.mxu1 %v4647_v16  ;;  %6516 = vst [vmem:[#allocation7_spill] sm:$0xff] %v5422_v37  ;;  %v5454_v49 = vpack.c.bf16 %v3291_v47, %v3290_v46  ;;  %v3324_v52 = vld [vmem:[%s6483_s1 + $0x280] sm:$0xff]  ;;  %v3325_v53 = vld [vmem:[%s6483_s1 + $0x288] sm:$0xff]  ;;  %v4671_v54 = vpack.c.bf16 %v3165_v51, %v3164_v50  ;;  %v3326_v56 = vld [vmem:[%s6483_s1 + $0x290] sm:$0xff] }
  0x1b   : > { %4778 = vmatpush3.bf16.msra.mxu0 %v5364_v17  ;;  %4652 = vmatprep.subr.bf16.mxu1 %v4651_v22  ;;  %6517 = vst [vmem:[#allocation8_spill] sm:$0xff] %v5438_v43  ;;  %v4799_v55 = vpack.c.bf16 %v3325_v53, %v3324_v52  ;;  %v3327_v57 = vld [vmem:[%s6483_s1 + $0x298] sm:$0xff]  ;;  %v230_v58 = vld [vmem:[%s5381_s28 + $0x8] sm:$0xff]  ;;  %v3166_v59 = vld [vmem:[%s6483_s1 + $0x90] sm:$0xff] }
  0x1c   : > { %4780 = vmatprep.subr.bf16.mxu0 %v5385_v23  ;;  %6518 = vst [vmem:[#allocation9_spill] sm:$0xff] %v5454_v49  ;;  %v3167_v60 = vld [vmem:[%s6483_s1 + $0x98] sm:$0xff]  ;;  %v5485_v61 = vld [vmem:[%s5381_s28 + $0x21] sm:$0xff]  ;;  %v4803_v63 = vpack.c.bf16 %v3327_v57, %v3326_v56  ;;  %v5509_v9 = vld [vmem:[%s5381_s28 + $0x30] sm:$0xff] }
  0x1d   : > { %v231_v62 = vld [vmem:[%s5381_s28 + $0x18] sm:$0xff]  ;;  %v4675_v1 = vpack.c.bf16 %v3167_v60, %v3166_v59  ;;  %v3328_v2 = vld [vmem:[%s6483_s1 + $0x2a0] sm:$0xff]  ;;  %v3329_v3 = vld [vmem:[%s6483_s1 + $0x2a8] sm:$0xff] }
  0x1e   : > { %4654 = vmatpush3.bf16.msra.mxu1 %v4651_v22  ;;  %v5489_v0 = vld [vmem:[%s5381_s28 + $0x31] sm:$0xff]  ;;  %v232_v4 = vld [vmem:[%s5381_s28 + $0x20] sm:$0xff]  ;;  %v3169_v6 = vld [vmem:[%s6483_s1 + $0xa8] sm:$0xff]  ;;  %v4807_v11 = vpack.c.bf16 %v3329_v3, %v3328_v2 }
  0x1f   : > { %4782 = vmatpush3.bf16.msra.mxu0 %v5385_v23  ;;  %4656 = vmatprep.subr.bf16.mxu1 %v4655_v30  ;;  %v3168_v5 = vld [vmem:[%s6483_s1 + $0xa0] sm:$0xff]  ;;  %v5513_v10 = vld [vmem:[%s5381_s28 + $0x49] sm:$0xff]  ;;  %v3331_v14 = vld [vmem:[%s6483_s1 + $0x2b8] sm:$0xff] }
  0x20   : > { %4784 = vmatprep.subr.bf16.mxu0 %v5406_v31  ;;  %v5506_v8 = vld [vmem:[%s5381_s28 + $0x39] sm:$0xff]  ;;  %v3330_v13 = vld [vmem:[%s6483_s1 + $0x2b0] sm:$0xff]  ;;  %v4679_v15 = vpack.c.bf16 %v3169_v6, %v3168_v5  ;;  %v5537_v21 = vld [vmem:[%s5381_s28 + $0x48] sm:$0xff] }
  0x21   : > { %v5524_v16 = vld [vmem:[%s5381_s28 + $0x38] sm:$0xff]  ;;  %v3170_v18 = vld [vmem:[%s6483_s1 + $0xb0] sm:$0xff]  ;;  %v5540_v22 = vld [vmem:[%s5381_s28 + $0x61] sm:$0xff]  ;;  %v4811_v24 = vpack.c.bf16 %v3331_v14, %v3330_v13 }
  0x22   : > { %4658 = vmatpush3.bf16.msra.mxu1 %v4655_v30  ;;  %v3171_v19 = vld [vmem:[%s6483_s1 + $0xb8] sm:$0xff]  ;;  %v3332_v25 = vld [vmem:[%s6483_s1 + $0x2c0] sm:$0xff]  ;;  %v3333_v26 = vld [vmem:[%s6483_s1 + $0x2c8] sm:$0xff] }
  0x23   : > { %4786 = vmatpush3.bf16.msra.mxu0 %v5406_v31  ;;  %4660 = vmatprep.subr.bf16.mxu1 %v4659_v36  ;;  %v5534_v20 = vld [vmem:[%s5381_s28 + $0x51] sm:$0xff]  ;;  %v4683_v27 = vpack.c.bf16 %v3171_v19, %v3170_v18  ;;  %v3172_v30 = vld [vmem:[%s6483_s1 + $0xc0] sm:$0xff]  ;;  %v3173_v32 = vld [vmem:[%s6483_s1 + $0xc8] sm:$0xff] }
  0x24   : > { %4788 = vmatprep.subr.bf16.mxu0 %v5422_v37  ;;  %v5552_v28 = vld [vmem:[%s5381_s28 + $0x50] sm:$0xff]  ;;  %v5565_v34 = vld [vmem:[%s5381_s28 + $0x60] sm:$0xff]  ;;  %v3335_v39 = vld [vmem:[%s6483_s1 + $0x2d8] sm:$0xff]  ;;  %v4687_v40 = vpack.c.bf16 %v3173_v32, %v3172_v30 }
  0x25   : > { %v5562_v33 = vld [vmem:[%s5381_s28 + $0x69] sm:$0xff]  ;;  %v5568_v35 = vld [vmem:[%s5381_s28 + $0x79] sm:$0xff]  ;;  %v5590_v45 = vld [vmem:[%s5381_s28 + $0x81] sm:$0xff] }
  0x26   : > { %4662 = vmatpush3.bf16.msra.mxu1 %v4659_v36  ;;  %v4815_v36 = vpack.c.bf16 %v3333_v26, %v3332_v25  ;;  %v3334_v38 = vld [vmem:[%s6483_s1 + $0x2d0] sm:$0xff]  ;;  %v5580_v41 = vld [vmem:[%s5381_s28 + $0x68] sm:$0xff]  ;;  %v3175_v44 = vld [vmem:[%s6483_s1 + $0xd8] sm:$0xff] }
  0x27   : > { %4790 = vmatpush3.bf16.msra.mxu0 %v5422_v37  ;;  %4664 = vmatprep.subr.bf16.mxu1 %v4663_v42  ;;  %v5593_v46 = vld [vmem:[%s5381_s28 + $0x78] sm:$0xff]  ;;  %v3336_v50 = vld [vmem:[%s6483_s1 + $0x2e0] sm:$0xff]  ;;  %v3337_v51 = vld [vmem:[%s6483_s1 + $0x2e8] sm:$0xff] }
  0x28   : > { %4792 = vmatprep.subr.bf16.mxu0 %v5438_v43  ;;  %v5596_v47 = vld [vmem:[%s5381_s28 + $0x91] sm:$0xff]  ;;  %v5608_v53 = vld [vmem:[%s5381_s28 + $0x80] sm:$0xff]  ;;  %v4823_v59 = vpack.c.bf16 %v3337_v51, %v3336_v50  ;;  %v5649_v5 = vld [vmem:[%s5381_s28 + $0xa8] sm:$0xff] }
  0x29   : > { %v5618_v56 = vld [vmem:[%s5381_s28 + $0x99] sm:$0xff]  ;;  %v5621_v57 = vld [vmem:[%s5381_s28 + $0x90] sm:$0xff]  ;;  %v5652_v6 = vld [vmem:[%s5381_s28 + $0xc1] sm:$0xff] }
  0x2a   : > { %4666 = vmatpush3.bf16.msra.mxu1 %v4663_v42  ;;  %v3174_v42 = vld [vmem:[%s6483_s1 + $0xd0] sm:$0xff]  ;;  %v3179_v3 = vld [vmem:[%s6483_s1 + $0xf8] sm:$0xff]  ;;  %v3372_v13 = vld [vmem:[%s6483_s1 + $0x300] sm:$0xff] }
  0x2b   : > { %4794 = vmatpush3.bf16.msra.mxu0 %v5438_v43  ;;  %4668 = vmatprep.subr.bf16.mxu1 %v4667_v48  ;;  %v4691_v52 = vpack.c.bf16 %v3175_v44, %v3174_v42  ;;  %v3338_v60 = vld [vmem:[%s6483_s1 + $0x2f0] sm:$0xff]  ;;  %v3373_v14 = vld [vmem:[%s6483_s1 + $0x308] sm:$0xff]  ;;  %v3180_v19 = vld [vmem:[%s6483_s1 + $0x100] sm:$0xff] }
  0x2c   : > { %4796 = vmatprep.subr.bf16.mxu0 %v5454_v49  ;;  %v3178_v2 = vld [vmem:[%s6483_s1 + $0xf0] sm:$0xff]  ;;  %v5677_v26 = vld [vmem:[%s5381_s28 + $0xc0] sm:$0xff]  ;;  %v4831_v30 = vpack.c.bf16 %v3373_v14, %v3372_v13  ;;  %v5701_v42 = vld [vmem:[%s5381_s28 + $0xd8] sm:$0xff] }
  0x2d   : > { %v5664_v18 = vld [vmem:[%s5381_s28 + $0xb0] sm:$0xff]  ;;  %v3376_v50 = vld [vmem:[%s6483_s1 + $0x320] sm:$0xff]  ;;  %v3377_v51 = vld [vmem:[%s6483_s1 + $0x328] sm:$0xff] }
  0x2e   : > { %4670 = vmatpush3.bf16.msra.mxu1 %v4667_v48  ;;  %v4819_v48 = vpack.c.bf16 %v3335_v39, %v3334_v38  ;;  %v5674_v25 = vld [vmem:[%s5381_s28 + $0xc9] sm:$0xff]  ;;  %v5704_v44 = vld [vmem:[%s5381_s28 + $0x32] sm:$0xff] }
  0x2f   : > { %4798 = vmatpush3.bf16.msra.mxu0 %v5454_v49  ;;  %4672 = vmatprep.subr.bf16.mxu1 %v4671_v54  ;;  %v3374_v32 = vld [vmem:[%s6483_s1 + $0x310] sm:$0xff]  ;;  %v5694_v39 = vld [vmem:[%s5381_s28 + $0xc8] sm:$0xff]  ;;  %v3384_v49 = vld [vmem:[%s6483_s1 + $0x360] sm:$0xff] }
  0x30   : > { %4800 = vmatprep.subr.bf16.mxu0 %v4799_v55  ;;  %v5749_v13 = vld [vmem:[%s5381_s28 + $0x62] sm:$0xff]  ;;  %v5815_v37 = vld [vmem:[%s5381_s28 + $0xaa] sm:$0xff]  ;;  %v3387_v17 = vld [vmem:[%s6483_s1 + $0x378] sm:$0xff] }
  0x31   : > { %3952 = vmatmul.mubr.f32.vlgmr.msra.gmra.mrb[0].mxu1 %v230_v58  ;;  %v5624_v58 = vld [vmem:[%s5381_s28 + $0xa9] sm:$0xff]  ;;  %6522 = vst [vmem:[#allocation13_spill] sm:$0xff] %v5815_v37 }
  0x32   : > { %4272 = vmatmul.mubr.f32.vlgmr.msra.gmra.mrb[0].mxu0 %v5485_v61  ;;  %4674 = vmatpush3.bf16.msra.mxu1 %v4671_v54  ;;  %v3176_v54 = vld [vmem:[%s6483_s1 + $0xe0] sm:$0xff]  ;;  %v3385_v43 = vld [vmem:[%s6483_s1 + $0x368] sm:$0xff]  ;;  %v3386_v23 = vld [vmem:[%s6483_s1 + $0x370] sm:$0xff] }
  0x33   : > { %4802 = vmatpush3.bf16.msra.mxu0 %v4799_v55  ;;  %3954 = vmatprep.mubr.f32.mxu1 %v231_v62  ;;  %v3177_v55 = vld [vmem:[%s6483_s1 + $0xe8] sm:$0xff]  ;;  %v3339_v62 = vld [vmem:[%s6483_s1 + $0x2f8] sm:$0xff]  ;;  %v4855_v31 = vpack.c.bf16 %v3385_v43, %v3384_v49  ;;  %v4859_v7 = vpack.c.bf16 %v3387_v17, %v3386_v23 }
  0x34   : > { %4274 = vmatprep.mubr.f32.mxu0 %v5489_v0  ;;  %4804 = vmatprep.subr.bf16.mxu0 %v4803_v63  ;;  %v5831_v43 = vld [vmem:[%s5381_s28 + $0xb2] sm:$0xff]  ;;  %v5834_v49 = vld [vmem:[%s5381_s28 + $0x168] sm:$0xff] }
  0x35   : > { %3955 = vmatmul.mubr.f32.gmra.mrb[2].mxu1 %v232_v4  ;;  %4676 = vmatprep.subr.bf16.mxu1 %v4675_v1  ;;  %v5646_v4 = vld [vmem:[%s5381_s28 + $0xb1] sm:$0xff]  ;;  %6523 = vst [vmem:[#allocation14_spill] sm:$0xff] %v5831_v43  ;;  %6524 = vst [vmem:[#allocation15_spill] sm:$0xff] %v5834_v49  ;;  %v5837_v12 = vld [vmem:[%s5381_s28 + $0xc2] sm:$0xff] }
  0x36   : > { %4275 = vmatmul.mubr.f32.gmra.mrb[2].mxu0 %v5506_v8  ;;  %3957 = vmatprep.mubr.f32.mxu1 %v5509_v9  ;;  %6525 = vst [vmem:[#allocation16_spill] sm:$0xff] %v5837_v12  ;;  %v5853_v17 = vld [vmem:[%s5381_s28 + $0xca] sm:$0xff]  ;;  %v534_v23 = vld [vmem:[%s5381_s28 + $0x1] sm:$0xff] }
  0x37   : > { %4806 = vmatpush3.bf16.msra.mxu0 %v4803_v63  ;;  %4277 = vmatprep.mubr.f32.mxu0 %v5513_v10  ;;  %v4695_v63 = vpack.c.bf16 %v3177_v55, %v3176_v54  ;;  %v5721_v54 = vld [vmem:[%s5381_s28 + $0x3a] sm:$0xff]  ;;  %v5724_v55 = vld [vmem:[%s5381_s28 + $0xf0] sm:$0xff] }
  0x38   : > { %4808 = vmatprep.subr.bf16.mxu0 %v4807_v11  ;;  %4678 = vmatpush3.bf16.msra.mxu1 %v4675_v1  ;;  %v5636_v1 = vld [vmem:[%s5381_s28 + $0x98] sm:$0xff] }
  0x39   : > { %3958 = vmatmul.mubr.f32.gmra.mrb[4].mxu1 %v5524_v16  ;;  %4680 = vmatprep.subr.bf16.mxu1 %v4679_v15 }
  0x3a   : > { %4278 = vmatmul.mubr.f32.gmra.mrb[4].mxu0 %v5534_v20  ;;  %3960 = vmatprep.mubr.f32.mxu1 %v5537_v21 }
  0x3b   : > { %4810 = vmatpush3.bf16.msra.mxu0 %v4807_v11  ;;  %4280 = vmatprep.mubr.f32.mxu0 %v5540_v22  ;;  %v4827_v11 = vpack.c.bf16 %v3339_v62, %v3338_v60  ;;  %v4839_v60 = vpack.c.bf16 %v3377_v51, %v3376_v50  ;;  %v3378_v62 = vld [vmem:[%s6483_s1 + $0x330] sm:$0xff]  ;;  %v3383_v51 = vld [vmem:[%s6483_s1 + $0x358] sm:$0xff] }
  0x3c   : > { %4812 = vmatprep.subr.bf16.mxu0 %v4811_v24  ;;  %4682 = vmatpush3.bf16.msra.mxu1 %v4679_v15  ;;  %v4699_v15 = vpack.c.bf16 %v3179_v3, %v3178_v2  ;;  %v5739_v2 = vld [vmem:[%s5381_s28 + $0xf8] sm:$0xff]  ;;  %v3382_v50 = vld [vmem:[%s6483_s1 + $0x350] sm:$0xff] }
  0x3d   : > { %3961 = vmatmul.mubr.f32.gmra.mrb[6].mxu1 %v5552_v28  ;;  %4684 = vmatprep.subr.bf16.mxu1 %v4683_v27  ;;  %v5743_v3 = vld [vmem:[%s5381_s28 + $0x52] sm:$0xff] }
  0x3e   : > { %4281 = vmatmul.mubr.f32.gmra.mrb[6].mxu0 %v5562_v33  ;;  %3963 = vmatprep.mubr.f32.mxu1 %v5565_v34 }
  0x3f   : > { %4814 = vmatpush3.bf16.msra.mxu0 %v4811_v24  ;;  %4283 = vmatprep.mubr.f32.mxu0 %v5568_v35  ;;  %v3181_v24 = vld [vmem:[%s6483_s1 + $0x108] sm:$0xff] }
  0x40   : > { %4816 = vmatprep.subr.bf16.mxu0 %v4815_v36  ;;  %4686 = vmatpush3.bf16.msra.mxu1 %v4683_v27  ;;  %v5680_v27 = vld [vmem:[%s5381_s28 + $0x1a] sm:$0xff]  ;;  %v5689_v38 = vpack.c.bf16 %v3181_v24, %v3180_v19  ;;  %v3381_v19 = vld [vmem:[%s6483_s1 + $0x348] sm:$0xff]  ;;  %v5761_v24 = vld [vmem:[%s5381_s28 + $0x110] sm:$0xff] }
  0x41   : > { %3964 = vmatmul.mubr.f32.gmra.mrb[8].mxu1 %v5580_v41  ;;  %4688 = vmatprep.subr.bf16.mxu1 %v4687_v40 }
  0x42   : > { %4284 = vmatmul.mubr.f32.gmra.mrb[8].mxu0 %v5590_v45  ;;  %3966 = vmatprep.mubr.f32.mxu1 %v5593_v46 }
  0x43   : > { %4818 = vmatpush3.bf16.msra.mxu0 %v4815_v36  ;;  %4286 = vmatprep.mubr.f32.mxu0 %v5596_v47  ;;  %v3375_v36 = vld [vmem:[%s6483_s1 + $0x318] sm:$0xff] }
  0x44   : > { %4820 = vmatprep.subr.bf16.mxu0 %v4819_v48  ;;  %4690 = vmatpush3.bf16.msra.mxu1 %v4687_v40  ;;  %v5698_v40 = vld [vmem:[%s5381_s28 + $0x22] sm:$0xff] }
  0x45   : > { %3967 = vmatmul.mubr.f32.gmra.mrb[10].mxu1 %v5608_v53  ;;  %4692 = vmatprep.subr.bf16.mxu1 %v4691_v52 }
  0x46   : > { %4287 = vmatmul.mubr.f32.gmra.mrb[10].mxu0 %v5618_v56  ;;  %3969 = vmatprep.mubr.f32.mxu1 %v5621_v57 }
  0x47   : > { %4822 = vmatpush3.bf16.msra.mxu0 %v4819_v48  ;;  %4289 = vmatprep.mubr.f32.mxu0 %v5624_v58  ;;  %v4835_v48 = vpack.c.bf16 %v3375_v36, %v3374_v32  ;;  %v5768_v32 = vld [vmem:[%s5381_s28 + $0x120] sm:$0xff] }
  0x48   : > { %4824 = vmatprep.subr.bf16.mxu0 %v4823_v59  ;;  %4694 = vmatpush3.bf16.msra.mxu1 %v4691_v52  ;;  %v5717_v52 = vld [vmem:[%s5381_s28 + $0xe0] sm:$0xff] }
  0x49   : > { %3970 = vmatmul.mubr.f32.gmra.mrb[12].mxu1 %v5636_v1  ;;  %4696 = vmatprep.subr.bf16.mxu1 %v4695_v63  ;;  %v5771_v36 = vld [vmem:[%s5381_s28 + $0x7a] sm:$0xff] }
  0x4a   : > { %4290 = vmatmul.mubr.f32.gmra.mrb[12].mxu0 %v5646_v4  ;;  %3972 = vmatprep.mubr.f32.mxu1 %v5649_v5 }
  0x4b   : > { %4826 = vmatpush3.bf16.msra.mxu0 %v4823_v59  ;;  %4292 = vmatprep.mubr.f32.mxu0 %v5652_v6  ;;  %v5727_v59 = vld [vmem:[%s5381_s28 + $0x4a] sm:$0xff] }
  0x4c   : > { %4828 = vmatprep.subr.bf16.mxu0 %v4827_v11  ;;  %4698 = vmatpush3.bf16.msra.mxu1 %v4695_v63  ;;  %v3379_v63 = vld [vmem:[%s6483_s1 + $0x338] sm:$0xff] }
  0x4d   : > { %3973 = vmatmul.mubr.f32.gmra.mrb[14].mxu1 %v5664_v18  ;;  %4700 = vmatprep.subr.bf16.mxu1 %v4699_v15  ;;  %v4843_v14 = vpack.c.bf16 %v3379_v63, %v3378_v62  ;;  %v5787_v62 = vld [vmem:[%s5381_s28 + $0x82] sm:$0xff]  ;;  %v5790_v63 = vld [vmem:[%s5381_s28 + $0x138] sm:$0xff] }
  0x4e   : > { %4293 = vmatmul.mubr.f32.gmra.mrb[14].mxu0 %v5674_v25  ;;  %3975 = vmatprep.mubr.f32.mxu1 %v5677_v26  ;;  %6519 = vst [vmem:[#allocation10_spill] sm:$0xff] %v5787_v62 }
  0x4f   : > { %4830 = vmatpush3.bf16.msra.mxu0 %v4827_v11  ;;  %4351 = vmatprep.mubr.f32.mxu0 %v5680_v27  ;;  %v5746_v11 = vld [vmem:[%s5381_s28 + $0x108] sm:$0xff] }
  0x50   : > { %4832 = vmatprep.subr.bf16.mxu0 %v4831_v30  ;;  %4702 = vmatpush3.bf16.msra.mxu1 %v4699_v15  ;;  %v3380_v15 = vld [vmem:[%s6483_s1 + $0x340] sm:$0xff] }
  0x51   : > { %3976 = vmatmul.mubr.f32.gmra.mrb[16].mxu1 %v5694_v39  ;;  %4704 = vmatprep.subr.bf16.mxu1 %v5689_v38 }
  0x52   : > { %4352 = vmatmul.mubr.f32.vlgmr.msra.gmra.mrb[0].mxu0 %v5698_v40  ;;  %3978 = vmatprep.mubr.f32.mxu1 %v5701_v42 }
  0x53   : > { %4354 = vmatprep.mubr.f32.mxu0 %v5704_v44  ;;  %4834 = vmatpush3.bf16.msra.mxu0 %v4831_v30  ;;  %v5765_v30 = vld [vmem:[%s5381_s28 + $0x6a] sm:$0xff] }
  0x54   : > { %4836 = vmatprep.subr.bf16.mxu0 %v4835_v48 }
  0x55   : > { %3979 = vmatmul.mubr.f32.gmra.mrb[18].mxu1 %v5717_v52 }
  0x56   : > { %4355 = vmatmul.mubr.f32.gmra.mrb[2].mxu0 %v5721_v54  ;;  %3981 = vmatprep.mubr.f32.mxu1 %v5724_v55 }
  0x57   : > { %4357 = vmatprep.mubr.f32.mxu0 %v5727_v59  ;;  %4838 = vmatpush3.bf16.msra.mxu0 %v4835_v48  ;;  %v4847_v48 = vpack.c.bf16 %v3381_v19, %v3380_v15  ;;  %v5793_v15 = vld [vmem:[%s5381_s28 + $0x92] sm:$0xff]  ;;  %v4851_v19 = vpack.c.bf16 %v3383_v51, %v3382_v50  ;;  %v5809_v50 = vld [vmem:[%s5381_s28 + $0x9a] sm:$0xff] }
  0x58   : > { %4840 = vmatprep.subr.bf16.mxu0 %v4839_v60  ;;  %6520 = vst [vmem:[#allocation11_spill] sm:$0xff] %v5793_v15  ;;  %6521 = vst [vmem:[#allocation12_spill] sm:$0xff] %v5809_v50  ;;  %v5812_v51 = vld [vmem:[%s5381_s28 + $0x150] sm:$0xff] }
  0x59   : > { %3982 = vmatmul.mubr.f32.gmra.mrb[20].mxu1 %v5739_v2 }
  0x5a   : > { %4358 = vmatmul.mubr.f32.gmra.mrb[4].mxu0 %v5743_v3  ;;  %3984 = vmatprep.mubr.f32.mxu1 %v5746_v11 }
  0x5b   : > { %4360 = vmatprep.mubr.f32.mxu0 %v5749_v13  ;;  %4842 = vmatpush3.bf16.msra.mxu0 %v4839_v60  ;;  %v5783_v60 = vld [vmem:[%s5381_s28 + $0x128] sm:$0xff] }
  0x5c   : > { %4844 = vmatprep.subr.bf16.mxu0 %v4843_v14 }
  0x5d   : > { %3985 = vmatmul.mubr.f32.gmra.mrb[22].mxu1 %v5761_v24 }
  0x5e   : > { %4361 = vmatmul.mubr.f32.gmra.mrb[6].mxu0 %v5765_v30  ;;  %3987 = vmatprep.mubr.f32.mxu1 %v5768_v32 }
  0x5f   : > { %4363 = vmatprep.mubr.f32.mxu0 %v5771_v36  ;;  %4846 = vmatpush3.bf16.msra.mxu0 %v4843_v14  ;;  %v5805_v14 = vld [vmem:[%s5381_s28 + $0x140] sm:$0xff] }
  0x60   : > { %4848 = vmatprep.subr.bf16.mxu0 %v4847_v48 }
  0x61   : > { %3988 = vmatmul.mubr.f32.gmra.mrb[24].mxu1 %v5783_v60 }
  0x62   : > { %4364 = vmatmul.mubr.f32.gmra.mrb[8].mxu0 %v5787_v62  ;;  %3990 = vmatprep.mubr.f32.mxu1 %v5790_v63 }
  0x63   : > { %4366 = vmatprep.mubr.f32.mxu0 %v5793_v15  ;;  %4850 = vmatpush3.bf16.msra.mxu0 %v4847_v48  ;;  %v5827_v48 = vld [vmem:[%s5381_s28 + $0x158] sm:$0xff] }
  0x64   : > { %4852 = vmatprep.subr.bf16.mxu0 %v4851_v19  ;;  %v5857_v15 = vld [vmem:[%s5381_s28 + $0xda] sm:$0xff] }
  0x65   : > { %3991 = vmatmul.mubr.f32.gmra.mrb[26].mxu1 %v5805_v14 }
  0x66   : > { %4367 = vmatmul.mubr.f32.gmra.mrb[10].mxu0 %v5809_v50  ;;  %3993 = vmatprep.mubr.f32.mxu1 %v5812_v51  ;;  %v3420_v50 = vld [vmem:[%s6483_s1 + $0x380] sm:$0xff] }
  0x67   : > { %4369 = vmatprep.mubr.f32.mxu0 %v5815_v37  ;;  %4854 = vmatpush3.bf16.msra.mxu0 %v4851_v19  ;;  %v3421_v37 = vld [vmem:[%s6483_s1 + $0x388] sm:$0xff]  ;;  %v5849_v19 = vld [vmem:[%s5381_s28 + $0x170] sm:$0xff] }
  0x68   : > { %4856 = vmatprep.subr.bf16.mxu0 %v4855_v31  ;;  %6526 = vst [vmem:[#allocation17_spill] sm:$0xff] %v5849_v19  ;;  %v5859_v62 = vpack.c.bf16 %v3421_v37, %v3420_v50  ;;  %v5872_v37 = vld [vmem:[%s5381_s28 + $0xe2] sm:$0xff]  ;;  %v5875_v50 = vld [vmem:[%s5381_s28 + $0xf2] sm:$0xff] }
  0x69   : > { %3994 = vmatmul.mubr.f32.gmra.mrb[28].mxu1 %v5827_v48 }
  0x6a   : > { %4370 = vmatmul.mubr.f32.gmra.mrb[12].mxu0 %v5831_v43  ;;  %3996 = vmatprep.mubr.f32.mxu1 %v5834_v49  ;;  %v3182_v43 = vld [vmem:[%s6483_s1 + $0x110] sm:$0xff]  ;;  %v3184_v49 = vld [vmem:[%s6483_s1 + $0x120] sm:$0xff] }
  0x6b   : > { %4372 = vmatprep.mubr.f32.mxu0 %v5837_v12  ;;  %4858 = vmatpush3.bf16.msra.mxu0 %v4855_v31  ;;  %v3183_v12 = vld [vmem:[%s6483_s1 + $0x118] sm:$0xff]  ;;  %v535_v31 = vld [vmem:[%s5381_s28 + $0x9] sm:$0xff] }
  0x6c   : > { %4860 = vmatprep.subr.bf16.mxu0 %v4859_v7 }
  0x6d   : > { %3997 = vmatmul.mubr.f32.gmra.mrb[30].mxu1 %v5849_v19  ;;  %v4707_v19 = vpack.c.bf16 %v3183_v12, %v3182_v43  ;;  %v5892_v12 = vld [vmem:[%s5381_s28 + $0x10a] sm:$0xff] }
  0x6e   : > { %4373 = vmatmul.mubr.f32.gmra.mrb[14].mxu0 %v5853_v17  ;;  %4031 = vmatprep.mubr.f32.mxu1 %v534_v23  ;;  %v3185_v23 = vld [vmem:[%s6483_s1 + $0x128] sm:$0xff] }
  0x6f   : > { %4375 = vmatprep.mubr.f32.mxu0 %v5857_v15  ;;  %4862 = vmatpush3.bf16.msra.mxu0 %v4859_v7  ;;  %v5889_v7 = vld [vmem:[%s5381_s28 + $0xfa] sm:$0xff]  ;;  %v4711_v43 = vpack.c.bf16 %v3185_v23, %v3184_v49 }
  0x70   : > { %4864 = vmatprep.subr.bf16.mxu0 %v5859_v62  ;;  %v3188_v23 = vld [vmem:[%s6483_s1 + $0x140] sm:$0xff] }
  0x71   : > { %4032 = vmatmul.mubr.f32.vlgmr.msra.gmra.mrb[0].mxu1 %v535_v31  ;;  %v3186_v31 = vld [vmem:[%s6483_s1 + $0x130] sm:$0xff] }
  0x72   : > { %4376 = vmatmul.mubr.f32.gmra.mrb[16].mxu0 %v5872_v37  ;;  %4706 = vmatpush3.bf16.msra.mxu1 %v5689_v38  ;;  %v3187_v38 = vld [vmem:[%s6483_s1 + $0x138] sm:$0xff] }
  0x73   : > { %4034 = vmatprep.mubr.f32.mxu1 %v5401_v29  ;;  %4378 = vmatprep.mubr.f32.mxu0 %v5875_v50  ;;  %v5905_v29 = vld [vmem:[%s5381_s28 + $0x112] sm:$0xff]  ;;  %v4715_v49 = vpack.c.bf16 %v3187_v38, %v3186_v31 }
  0x74   : > { %4708 = vmatprep.subr.bf16.mxu1 %v4707_v19  ;;  %v3190_v38 = vld [vmem:[%s6483_s1 + $0x150] sm:$0xff] }
  0x75   : > { %4035 = vmatmul.mubr.f32.gmra.mrb[2].mxu1 %v5485_v61  ;;  %v5908_v61 = vld [vmem:[%s5381_s28 + $0x122] sm:$0xff] }
  0x76   : > { %4379 = vmatmul.mubr.f32.gmra.mrb[18].mxu0 %v5889_v7  ;;  %4037 = vmatprep.mubr.f32.mxu1 %v5489_v0  ;;  %v3189_v0 = vld [vmem:[%s6483_s1 + $0x148] sm:$0xff] }
  0x77   : > { %4381 = vmatprep.mubr.f32.mxu0 %v5892_v12  ;;  %4710 = vmatpush3.bf16.msra.mxu1 %v4707_v19  ;;  %v5921_v19 = vld [vmem:[%s5381_s28 + $0x12a] sm:$0xff]  ;;  %v4719_v31 = vpack.c.bf16 %v3189_v0, %v3188_v23  ;;  %v3192_v0 = vld [vmem:[%s6483_s1 + $0x160] sm:$0xff] }
  0x78   : > { %4712 = vmatprep.subr.bf16.mxu1 %v4711_v43 }
  0x79   : > { %4038 = vmatmul.mubr.f32.gmra.mrb[4].mxu1 %v5506_v8  ;;  %v5924_v8 = vld [vmem:[%s5381_s28 + $0x13a] sm:$0xff] }
  0x7a   : > { %4382 = vmatmul.mubr.f32.gmra.mrb[20].mxu0 %v5905_v29  ;;  %4040 = vmatprep.mubr.f32.mxu1 %v5513_v10  ;;  %v3191_v10 = vld [vmem:[%s6483_s1 + $0x158] sm:$0xff] }
  0x7b   : > { %4384 = vmatprep.mubr.f32.mxu0 %v5908_v61  ;;  %4714 = vmatpush3.bf16.msra.mxu1 %v4711_v43  ;;  %v5937_v43 = vld [vmem:[%s5381_s28 + $0x142] sm:$0xff]  ;;  %v4723_v23 = vpack.c.bf16 %v3191_v10, %v3190_v38  ;;  %v3194_v10 = vld [vmem:[%s6483_s1 + $0x170] sm:$0xff] }
  0x7c   : > { %4716 = vmatprep.subr.bf16.mxu1 %v4715_v49 }
  0x7d   : > { %4041 = vmatmul.mubr.f32.gmra.mrb[6].mxu1 %v5534_v20  ;;  %v5940_v20 = vld [vmem:[%s5381_s28 + $0x152] sm:$0xff] }
  0x7e   : > { %4385 = vmatmul.mubr.f32.gmra.mrb[22].mxu0 %v5921_v19  ;;  %4043 = vmatprep.mubr.f32.mxu1 %v5540_v22  ;;  %v3193_v22 = vld [vmem:[%s6483_s1 + $0x168] sm:$0xff] }
  0x7f   : > { %4387 = vmatprep.mubr.f32.mxu0 %v5924_v8  ;;  %4718 = vmatpush3.bf16.msra.mxu1 %v4715_v49  ;;  %v5953_v49 = vld [vmem:[%s5381_s28 + $0x15a] sm:$0xff]  ;;  %v4727_v38 = vpack.c.bf16 %v3193_v22, %v3192_v0  ;;  %v3322_v0 = vld [vmem:[%s5381_s28 + $0x182] sm:$0xff] }
  0x80   : > { %4720 = vmatprep.subr.bf16.mxu1 %v4719_v31  ;;  %6527 = vst [vmem:[#allocation18_spill] sm:$0xff] %v5953_v49  ;;  %v3228_v22 = vld [vmem:[%s6483_s1 + $0x180] sm:$0xff] }
  0x81   : > { %4044 = vmatmul.mubr.f32.gmra.mrb[8].mxu1 %v5562_v33  ;;  %v5956_v33 = vld [vmem:[%s5381_s28 + $0x16a] sm:$0xff] }
  0x82   : > { %4388 = vmatmul.mubr.f32.gmra.mrb[24].mxu0 %v5937_v43  ;;  %4046 = vmatprep.mubr.f32.mxu1 %v5568_v35  ;;  %v3195_v35 = vld [vmem:[%s6483_s1 + $0x178] sm:$0xff] }
  0x83   : > { %4390 = vmatprep.mubr.f32.mxu0 %v5940_v20  ;;  %4722 = vmatpush3.bf16.msra.mxu1 %v4719_v31  ;;  %v5969_v31 = vld [vmem:[%s5381_s28 + $0x172] sm:$0xff] }
  0x84   : > { %4724 = vmatprep.subr.bf16.mxu1 %v4723_v23 }
  0x85   : > { %4047 = vmatmul.mubr.f32.gmra.mrb[10].mxu1 %v5590_v45  ;;  %v4731_v45 = vpack.c.bf16 %v3195_v35, %v3194_v10  ;;  %v3423_v35 = vld [vmem:[%s6483_s1 + $0x398] sm:$0xff] }
  0x86   : > { %4391 = vmatmul.mubr.f32.gmra.mrb[26].mxu0 %v5953_v49  ;;  %4049 = vmatprep.mubr.f32.mxu1 %v5596_v47  ;;  %v3229_v49 = vld [vmem:[%s6483_s1 + $0x188] sm:$0xff] }
  0x87   : > { %4393 = vmatprep.mubr.f32.mxu0 %v5956_v33  ;;  %4726 = vmatpush3.bf16.msra.mxu1 %v4723_v23  ;;  %v3323_v23 = vld [vmem:[%s5381_s28 + $0x18a] sm:$0xff]  ;;  %v5982_v10 = vpack.c.bf16 %v3229_v49, %v3228_v22 }
  0x88   : > { %4728 = vmatprep.subr.bf16.mxu1 %v4727_v38  ;;  %v3426_v22 = vld [vmem:[%s6483_s1 + $0x3b0] sm:$0xff] }
  0x89   : > { %4050 = vmatmul.mubr.f32.gmra.mrb[12].mxu1 %v5618_v56  ;;  %v3422_v56 = vld [vmem:[%s6483_s1 + $0x390] sm:$0xff] }
  0x8a   : > { %4394 = vmatmul.mubr.f32.gmra.mrb[28].mxu0 %v5969_v31  ;;  %4052 = vmatprep.mubr.f32.mxu1 %v5624_v58  ;;  %v5994_v58 = vld [vmem:[%s5381_s28 + $0xd9] sm:$0xff]  ;;  %v4867_v49 = vpack.c.bf16 %v3423_v35, %v3422_v56  ;;  %v6044_v35 = vld [vmem:[%s5381_s28 + $0x121] sm:$0xff] }
  0x8b   : > { %4396 = vmatprep.mubr.f32.mxu0 %v3322_v0  ;;  %4730 = vmatpush3.bf16.msra.mxu1 %v4727_v38  ;;  %v3425_v38 = vld [vmem:[%s6483_s1 + $0x3a8] sm:$0xff]  ;;  %v6012_v0 = vld [vmem:[%s5381_s28 + $0xf1] sm:$0xff]  ;;  %v3428_v56 = vld [vmem:[%s6483_s1 + $0x3c0] sm:$0xff] }
  0x8c   : > { %4732 = vmatprep.subr.bf16.mxu1 %v4731_v45 }
  0x8d   : > { %4053 = vmatmul.mubr.f32.gmra.mrb[14].mxu1 %v5646_v4  ;;  %v3424_v4 = vld [vmem:[%s6483_s1 + $0x3a0] sm:$0xff] }
  0x8e   : > { %4397 = vmatmul.mubr.f32.gmra.mrb[30].mxu0 %v3323_v23  ;;  %4055 = vmatprep.mubr.f32.mxu1 %v5652_v6 }
  0x8f   : > { %4431 = vmatprep.mubr.f32.mxu0 %v5509_v9  ;;  %4734 = vmatpush3.bf16.msra.mxu1 %v4731_v45  ;;  %v6007_v9 = vld [vmem:[%s5381_s28 + $0xe1] sm:$0xff]  ;;  %v4871_v45 = vpack.c.bf16 %v3425_v38, %v3424_v4  ;;  %v3430_v4 = vld [vmem:[%s6483_s1 + $0x3d0] sm:$0xff]  ;;  %v6060_v38 = vld [vmem:[%s5381_s28 + $0x139] sm:$0xff] }
  0x90   : > { %4736 = vmatprep.subr.bf16.mxu1 %v5982_v10 }
  0x91   : > { %4056 = vmatmul.mubr.f32.gmra.mrb[16].mxu1 %v5674_v25 }
  0x92   : > { %4432 = vmatmul.mubr.f32.vlgmr.msra.gmra.mrb[0].mxu0 %v5524_v16  ;;  %4058 = vmatprep.mubr.f32.mxu1 %v5994_v58  ;;  %v3427_v16 = vld [vmem:[%s6483_s1 + $0x3b8] sm:$0xff] }
  0x93   : > { %4434 = vmatprep.mubr.f32.mxu0 %v5537_v21  ;;  %4866 = vmatpush3.bf16.msra.mxu0 %v5859_v62  ;;  %v6024_v21 = vld [vmem:[%s5381_s28 + $0xf9] sm:$0xff]  ;;  %v6028_v62 = vld [vmem:[%s5381_s28 + $0x109] sm:$0xff]  ;;  %v4875_v23 = vpack.c.bf16 %v3427_v16, %v3426_v22  ;;  %v6076_v16 = vld [vmem:[%s5381_s28 + $0x151] sm:$0xff] }
  0x94   : > { %4868 = vmatprep.subr.bf16.mxu0 %v4867_v49  ;;  %v3432_v22 = vld [vmem:[%s6483_s1 + $0x3e0] sm:$0xff] }
  0x95   : > { %4059 = vmatmul.mubr.f32.gmra.mrb[18].mxu1 %v6007_v9 }
  0x96   : > { %4435 = vmatmul.mubr.f32.gmra.mrb[2].mxu0 %v5552_v28  ;;  %4061 = vmatprep.mubr.f32.mxu1 %v6012_v0  ;;  %v3429_v28 = vld [vmem:[%s6483_s1 + $0x3c8] sm:$0xff] }
  0x97   : > { %4437 = vmatprep.mubr.f32.mxu0 %v5565_v34  ;;  %4870 = vmatpush3.bf16.msra.mxu0 %v4867_v49  ;;  %v6040_v34 = vld [vmem:[%s5381_s28 + $0x111] sm:$0xff]  ;;  %v4879_v49 = vpack.c.bf16 %v3429_v28, %v3428_v56  ;;  %v6092_v28 = vld [vmem:[%s5381_s28 + $0x169] sm:$0xff] }
  0x98   : > { %4872 = vmatprep.subr.bf16.mxu0 %v4871_v45  ;;  %v3434_v56 = vld [vmem:[%s6483_s1 + $0x3f0] sm:$0xff] }
  0x99   : > { %4062 = vmatmul.mubr.f32.gmra.mrb[20].mxu1 %v6024_v21 }
  0x9a   : > { %4438 = vmatmul.mubr.f32.gmra.mrb[4].mxu0 %v5580_v41  ;;  %4064 = vmatprep.mubr.f32.mxu1 %v6028_v62  ;;  %v3431_v41 = vld [vmem:[%s6483_s1 + $0x3d8] sm:$0xff] }
  0x9b   : > { %4440 = vmatprep.mubr.f32.mxu0 %v5593_v46  ;;  %4874 = vmatpush3.bf16.msra.mxu0 %v4871_v45  ;;  %v6056_v46 = vld [vmem:[%s5381_s28 + $0x129] sm:$0xff]  ;;  %v4883_v45 = vpack.c.bf16 %v3431_v41, %v3430_v4  ;;  %v3468_v4 = vld [vmem:[%s6483_s1 + $0x400] sm:$0xff] }
  0x9c   : > { %4876 = vmatprep.subr.bf16.mxu0 %v4875_v23  ;;  %v840_v41 = vld [vmem:[%s5381_s28 + $0x2] sm:$0xff] }
  0x9d   : > { %4065 = vmatmul.mubr.f32.gmra.mrb[22].mxu1 %v6040_v34 }
  0x9e   : > { %4441 = vmatmul.mubr.f32.gmra.mrb[6].mxu0 %v5608_v53  ;;  %4067 = vmatprep.mubr.f32.mxu1 %v6044_v35  ;;  %v3433_v53 = vld [vmem:[%s6483_s1 + $0x3e8] sm:$0xff] }
  0x9f   : > { %4443 = vmatprep.mubr.f32.mxu0 %v5621_v57  ;;  %4878 = vmatpush3.bf16.msra.mxu0 %v4875_v23  ;;  %v6072_v57 = vld [vmem:[%s5381_s28 + $0x141] sm:$0xff]  ;;  %v4887_v23 = vpack.c.bf16 %v3433_v53, %v3432_v22  ;;  %v3230_v22 = vld [vmem:[%s6483_s1 + $0x190] sm:$0xff] }
  0xa0   : > { %4880 = vmatprep.subr.bf16.mxu0 %v4879_v49  ;;  %v841_v53 = vld [vmem:[%s5381_s28 + $0xa] sm:$0xff] }
  0xa1   : > { %4068 = vmatmul.mubr.f32.gmra.mrb[24].mxu1 %v6056_v46 }
  0xa2   : > { %4444 = vmatmul.mubr.f32.gmra.mrb[8].mxu0 %v5636_v1  ;;  %4070 = vmatprep.mubr.f32.mxu1 %v6060_v38  ;;  %v3435_v1 = vld [vmem:[%s6483_s1 + $0x3f8] sm:$0xff] }
  0xa3   : > { %4446 = vmatprep.mubr.f32.mxu0 %v5649_v5  ;;  %4882 = vmatpush3.bf16.msra.mxu0 %v4879_v49  ;;  %v6088_v5 = vld [vmem:[%s5381_s28 + $0x159] sm:$0xff]  ;;  %v4891_v49 = vpack.c.bf16 %v3435_v1, %v3434_v56  ;;  %v3233_v56 = vld [vmem:[%s6483_s1 + $0x1a8] sm:$0xff] }
  0xa4   : > { %4884 = vmatprep.subr.bf16.mxu0 %v4883_v45  ;;  %v3235_v1 = vld [vmem:[%s6483_s1 + $0x1b8] sm:$0xff] }
  0xa5   : > { %4071 = vmatmul.mubr.f32.gmra.mrb[26].mxu1 %v6072_v57 }
  0xa6   : > { %4447 = vmatmul.mubr.f32.gmra.mrb[10].mxu0 %v5664_v18  ;;  %4073 = vmatprep.mubr.f32.mxu1 %v6076_v16  ;;  %v3469_v18 = vld [vmem:[%s6483_s1 + $0x408] sm:$0xff] }
  0xa7   : > { %4449 = vmatprep.mubr.f32.mxu0 %v5677_v26  ;;  %4886 = vmatpush3.bf16.msra.mxu0 %v4883_v45  ;;  %v6104_v26 = vld [vmem:[%s5381_s28 + $0x171] sm:$0xff]  ;;  %v6108_v45 = vpack.c.bf16 %v3469_v18, %v3468_v4 }
  0xa8   : > { %4888 = vmatprep.subr.bf16.mxu0 %v4887_v23  ;;  %v6532_v4 = vld [vmem:[#allocation12_spill] sm:$0xff]  ;;  %v6533_v18 = vld [vmem:[#allocation13_spill] sm:$0xff] }
  0xa9   : > { %4074 = vmatmul.mubr.f32.gmra.mrb[28].mxu1 %v6088_v5 }
  0xaa   : > { %4450 = vmatmul.mubr.f32.gmra.mrb[12].mxu0 %v5694_v39  ;;  %4076 = vmatprep.mubr.f32.mxu1 %v6092_v28  ;;  %v3231_v39 = vld [vmem:[%s6483_s1 + $0x198] sm:$0xff] }
  0xab   : > { %4452 = vmatprep.mubr.f32.mxu0 %v5701_v42  ;;  %4890 = vmatpush3.bf16.msra.mxu0 %v4887_v23  ;;  %v4739_v42 = vpack.c.bf16 %v3231_v39, %v3230_v22  ;;  %v3232_v23 = vld [vmem:[%s6483_s1 + $0x1a0] sm:$0xff]  ;;  %v3388_v22 = vld [vmem:[%s5381_s28 + $0x31] sm:$0xff] }
  0xac   : > { %4892 = vmatprep.subr.bf16.mxu0 %v4891_v49  ;;  %v6534_v39 = vld [vmem:[#allocation14_spill] sm:$0xff] }
  0xad   : > { %4077 = vmatmul.mubr.f32.gmra.mrb[30].mxu1 %v6104_v26 }
  0xae   : > { %4453 = vmatmul.mubr.f32.gmra.mrb[14].mxu0 %v5717_v52  ;;  %4111 = vmatprep.mubr.f32.mxu1 %v840_v41  ;;  %v4743_v52 = vpack.c.bf16 %v3233_v56, %v3232_v23  ;;  %v3371_v41 = vld [vmem:[%s5381_s28 + $0x1a0] sm:$0xff]  ;;  %v6535_v23 = vld [vmem:[#allocation16_spill] sm:$0xff] }
  0xaf   : > { %4455 = vmatprep.mubr.f32.mxu0 %v5724_v55  ;;  %4894 = vmatpush3.bf16.msra.mxu0 %v4891_v49  ;;  %v3234_v55 = vld [vmem:[%s6483_s1 + $0x1b0] sm:$0xff]  ;;  %v3389_v56 = vld [vmem:[%s5381_s28 + $0x39] sm:$0xff] }
  0xb0   : > { %4896 = vmatprep.subr.bf16.mxu0 %v6108_v45 }
  0xb1   : > { %4112 = vmatmul.mubr.f32.vlgmr.msra.gmra.mrb[0].mxu1 %v841_v53  ;;  %v3470_v53 = vld [vmem:[%s6483_s1 + $0x410] sm:$0xff] }
  0xb2   : > { %4456 = vmatmul.mubr.f32.gmra.mrb[16].mxu0 %v5739_v2  ;;  %4738 = vmatpush3.bf16.msra.mxu1 %v5982_v10  ;;  %v3237_v2 = vld [vmem:[%s6483_s1 + $0x1c8] sm:$0xff]  ;;  %v3370_v10 = vld [vmem:[%s5381_s28 + $0x198] sm:$0xff] }
  0xb3   : > { %4114 = vmatprep.mubr.f32.mxu1 %v5680_v27  ;;  %4458 = vmatprep.mubr.f32.mxu0 %v5746_v11  ;;  %v4747_v27 = vpack.c.bf16 %v3235_v1, %v3234_v55  ;;  %v3239_v11 = vld [vmem:[%s6483_s1 + $0x1d8] sm:$0xff]  ;;  %v6536_v1 = vld [vmem:[#allocation2_spill] sm:$0xff] }
  0xb4   : > { %4740 = vmatprep.subr.bf16.mxu1 %v4739_v42 }
  0xb5   : > { %4115 = vmatmul.mubr.f32.gmra.mrb[2].mxu1 %v5698_v40  ;;  %v3236_v40 = vld [vmem:[%s6483_s1 + $0x1c0] sm:$0xff] }
  0xb6   : > { %4459 = vmatmul.mubr.f32.gmra.mrb[18].mxu0 %v5761_v24  ;;  %4117 = vmatprep.mubr.f32.mxu1 %v5704_v44  ;;  %v4751_v44 = vpack.c.bf16 %v3237_v2, %v3236_v40  ;;  %v3241_v24 = vld [vmem:[%s6483_s1 + $0x1e8] sm:$0xff]  ;;  %v3391_v2 = vld [vmem:[%s5381_s28 + $0x51] sm:$0xff] }
  0xb7   : > { %4461 = vmatprep.mubr.f32.mxu0 %v5768_v32  ;;  %4742 = vmatpush3.bf16.msra.mxu1 %v4739_v42  ;;  %v6172_v32 = vld [vmem:[%s5381_s28 + $0x180] sm:$0xff]  ;;  %v3471_v42 = vld [vmem:[%s6483_s1 + $0x418] sm:$0xff]  ;;  %v3473_v40 = vld [vmem:[%s6483_s1 + $0x428] sm:$0xff] }
  0xb8   : > { %4744 = vmatprep.subr.bf16.mxu1 %v4743_v52  ;;  %v4899_v55 = vpack.c.bf16 %v3471_v42, %v3470_v53  ;;  %v6541_v53 = vld [vmem:[#allocation6_spill] sm:$0xff]  ;;  %v3207_v42 = vld [vmem:[%s5381_s28 + $0x98] sm:$0xff] }
  0xb9   : > { %4118 = vmatmul.mubr.f32.gmra.mrb[4].mxu1 %v5721_v54  ;;  %v3238_v54 = vld [vmem:[%s6483_s1 + $0x1d0] sm:$0xff] }
  0xba   : > { %4462 = vmatmul.mubr.f32.gmra.mrb[20].mxu0 %v5783_v60  ;;  %4120 = vmatprep.mubr.f32.mxu1 %v5727_v59  ;;  %v4755_v59 = vpack.c.bf16 %v3239_v11, %v3238_v54  ;;  %v6529_v60 = vld [vmem:[#allocation10_spill] sm:$0xff]  ;;  %v3474_v54 = vld [vmem:[%s6483_s1 + $0x430] sm:$0xff]  ;;  %v3475_v11 = vld [vmem:[%s6483_s1 + $0x438] sm:$0xff] }
  0xbb   : > { %4464 = vmatprep.mubr.f32.mxu0 %v5790_v63  ;;  %4746 = vmatpush3.bf16.msra.mxu1 %v4743_v52  ;;  %v3242_v63 = vld [vmem:[%s6483_s1 + $0x1f0] sm:$0xff] }
  0xbc   : > { %4748 = vmatprep.subr.bf16.mxu1 %v4747_v27  ;;  %v3390_v52 = vld [vmem:[%s5381_s28 + $0x49] sm:$0xff] }
  0xbd   : > { %4121 = vmatmul.mubr.f32.gmra.mrb[6].mxu1 %v5743_v3  ;;  %v3240_v3 = vld [vmem:[%s6483_s1 + $0x1e0] sm:$0xff] }
  0xbe   : > { %4465 = vmatmul.mubr.f32.gmra.mrb[22].mxu0 %v5805_v14  ;;  %4123 = vmatprep.mubr.f32.mxu1 %v5749_v13  ;;  %v6528_v13 = vld [vmem:[#allocation15_spill] sm:$0xff]  ;;  %v3243_v14 = vld [vmem:[%s6483_s1 + $0x1f8] sm:$0xff] }
  0xbf   : > { %4467 = vmatprep.mubr.f32.mxu0 %v5812_v51  ;;  %4750 = vmatpush3.bf16.msra.mxu1 %v4747_v27  ;;  %v6531_v51 = vld [vmem:[#allocation11_spill] sm:$0xff]  ;;  %v4763_v49 = vpack.c.bf16 %v3243_v14, %v3242_v63  ;;  %v3472_v27 = vld [vmem:[%s6483_s1 + $0x420] sm:$0xff]  ;;  %v3483_v14 = vld [vmem:[%s6483_s1 + $0x478] sm:$0xff] }
  0xc0   : > { %4752 = vmatprep.subr.bf16.mxu1 %v4751_v44  ;;  %v3481_v63 = vld [vmem:[%s6483_s1 + $0x468] sm:$0xff] }
  0xc1   : > { %4124 = vmatmul.mubr.f32.gmra.mrb[8].mxu1 %v5765_v30  ;;  %v4759_v30 = vpack.c.bf16 %v3241_v24, %v3240_v3  ;;  %v3477_v3 = vld [vmem:[%s6483_s1 + $0x448] sm:$0xff] }
  0xc2   : > { %4468 = vmatmul.mubr.f32.gmra.mrb[24].mxu0 %v5827_v48  ;;  %4126 = vmatprep.mubr.f32.mxu1 %v5771_v36  ;;  %v6530_v36 = vld [vmem:[#allocation17_spill] sm:$0xff]  ;;  %v6185_v48 = vld [vmem:[%s5381_s28 + $0x188] sm:$0xff] }
  0xc3   : > { %4470 = vmatprep.mubr.f32.mxu0 %v6528_v13  ;;  %4754 = vmatpush3.bf16.msra.mxu1 %v4751_v44  ;;  %v3392_v44 = vld [vmem:[%s5381_s28 + $0x61] sm:$0xff]  ;;  %v3479_v13 = vld [vmem:[%s6483_s1 + $0x458] sm:$0xff] }
  0xc4   : > { %4756 = vmatprep.subr.bf16.mxu1 %v4755_v59 }
  0xc5   : > { %4127 = vmatmul.mubr.f32.gmra.mrb[10].mxu1 %v6529_v60 }
  0xc6   : > { %4471 = vmatmul.mubr.f32.gmra.mrb[26].mxu0 %v6530_v36  ;;  %4129 = vmatprep.mubr.f32.mxu1 %v6531_v51  ;;  %v6537_v36 = vld [vmem:[#allocation18_spill] sm:$0xff]  ;;  %v3201_v51 = vld [vmem:[%s5381_s28 + $0x50] sm:$0xff] }
  0xc7   : > { %4473 = vmatprep.mubr.f32.mxu0 %v6172_v32  ;;  %4758 = vmatpush3.bf16.msra.mxu1 %v4755_v59  ;;  %v4907_v59 = vpack.c.bf16 %v3475_v11, %v3474_v54  ;;  %v3212_v54 = vld [vmem:[%s5381_s28 + $0xd8] sm:$0xff] }
  0xc8   : > { %4760 = vmatprep.subr.bf16.mxu1 %v4759_v30  ;;  %v3436_v11 = vld [vmem:[%s5381_s28 + $0x32] sm:$0xff] }
  0xc9   : > { %4130 = vmatmul.mubr.f32.gmra.mrb[12].mxu1 %v6532_v4  ;;  %v3203_v4 = vld [vmem:[%s5381_s28 + $0x68] sm:$0xff] }
  0xca   : > { %4474 = vmatmul.mubr.f32.gmra.mrb[28].mxu0 %v6185_v48  ;;  %4132 = vmatprep.mubr.f32.mxu1 %v6533_v18  ;;  %v3204_v18 = vld [vmem:[%s5381_s28 + $0x78] sm:$0xff] }
  0xcb   : > { %4476 = vmatprep.mubr.f32.mxu0 %v3370_v10  ;;  %4762 = vmatpush3.bf16.msra.mxu1 %v4759_v30  ;;  %v3398_v30 = vld [vmem:[%s5381_s28 + $0xa9] sm:$0xff]  ;;  %v3202_v10 = vld [vmem:[%s5381_s28 + $0x60] sm:$0xff] }
  0xcc   : > { %4764 = vmatprep.subr.bf16.mxu1 %v4763_v49 }
  0xcd   : > { %4133 = vmatmul.mubr.f32.gmra.mrb[14].mxu1 %v6534_v39  ;;  %v3206_v39 = vld [vmem:[%s5381_s28 + $0x90] sm:$0xff] }
  0xce   : > { %4477 = vmatmul.mubr.f32.gmra.mrb[30].mxu0 %v3371_v41  ;;  %4135 = vmatprep.mubr.f32.mxu1 %v6535_v23  ;;  %v6540_v41 = vld [vmem:[#allocation5_spill] sm:$0xff]  ;;  %v3208_v23 = vld [vmem:[%s5381_s28 + $0xa8] sm:$0xff] }
  0xcf   : > { %4511 = vmatprep.mubr.f32.mxu0 %v3388_v22  ;;  %4766 = vmatpush3.bf16.msra.mxu1 %v4763_v49  ;;  %v6539_v49 = vld [vmem:[#allocation4_spill] sm:$0xff]  ;;  %v3205_v22 = vld [vmem:[%s5381_s28 + $0x80] sm:$0xff] }
  0xd0   : > { %4927 = vmatprep.subr.bf16.mxu1 %v6536_v1 }
  0xd1   : > { %4136 = vmatmul.mubr.f32.gmra.mrb[16].mxu1 %v5853_v17  ;;  %v4903_v17 = vpack.c.bf16 %v3473_v40, %v3472_v27  ;;  %v3210_v27 = vld [vmem:[%s5381_s28 + $0xc0] sm:$0xff] }
  0xd2   : > { %4512 = vmatmul.mubr.f32.vlgmr.msra.gmra.mrb[0].mxu0 %v3389_v56  ;;  %4138 = vmatprep.mubr.f32.mxu1 %v5857_v15  ;;  %v3393_v15 = vld [vmem:[%s5381_s28 + $0x69] sm:$0xff]  ;;  %v6303_v56 = vld [vmem:[%s5381_s28 + $0x181] sm:$0xff]  ;;  %v3418_v40 = vld [vmem:[%s5381_s28 + $0x199] sm:$0xff] }
  0xd3   : > { %4514 = vmatprep.mubr.f32.mxu0 %v3390_v52  ;;  %4898 = vmatpush3.bf16.msra.mxu0 %v6108_v45  ;;  %v3394_v45 = vld [vmem:[%s5381_s28 + $0x79] sm:$0xff]  ;;  %v6542_v52 = vld [vmem:[#allocation7_spill] sm:$0xff] }
  0xd4   : > { %4900 = vmatprep.subr.bf16.mxu0 %v4899_v55 }
  0xd5   : > { %4139 = vmatmul.mubr.f32.gmra.mrb[18].mxu1 %v5872_v37  ;;  %v3476_v37 = vld [vmem:[%s6483_s1 + $0x440] sm:$0xff] }
  0xd6   : > { %4515 = vmatmul.mubr.f32.gmra.mrb[2].mxu0 %v3391_v2  ;;  %4141 = vmatprep.mubr.f32.mxu1 %v5875_v50  ;;  %v3395_v50 = vld [vmem:[%s5381_s28 + $0x81] sm:$0xff]  ;;  %v4911_v24 = vpack.c.bf16 %v3477_v3, %v3476_v37  ;;  %v6543_v2 = vld [vmem:[#allocation8_spill] sm:$0xff] }
  0xd7   : > { %4517 = vmatprep.mubr.f32.mxu0 %v3392_v44  ;;  %4902 = vmatpush3.bf16.msra.mxu0 %v4899_v55  ;;  %v3209_v55 = vld [vmem:[%s5381_s28 + $0xb0] sm:$0xff]  ;;  %v3211_v44 = vld [vmem:[%s5381_s28 + $0xc8] sm:$0xff] }
  0xd8   : > { %4904 = vmatprep.subr.bf16.mxu0 %v4903_v17  ;;  %v3214_v37 = vld [vmem:[%s5381_s28 + $0xf0] sm:$0xff] }
  0xd9   : > { %4142 = vmatmul.mubr.f32.gmra.mrb[20].mxu1 %v5889_v7  ;;  %v3478_v7 = vld [vmem:[%s6483_s1 + $0x450] sm:$0xff] }
  0xda   : > { %4518 = vmatmul.mubr.f32.gmra.mrb[4].mxu0 %v3393_v15  ;;  %4144 = vmatprep.mubr.f32.mxu1 %v5892_v12  ;;  %v3397_v12 = vld [vmem:[%s5381_s28 + $0x99] sm:$0xff]  ;;  %v4915_v60 = vpack.c.bf16 %v3479_v13, %v3478_v7  ;;  %v3438_v3 = vld [vmem:[%s5381_s28 + $0x4a] sm:$0xff]  ;;  %v3440_v13 = vld [vmem:[%s5381_s28 + $0x62] sm:$0xff] }
  0xdb   : > { %4520 = vmatprep.mubr.f32.mxu0 %v3394_v45  ;;  %4906 = vmatpush3.bf16.msra.mxu0 %v4903_v17  ;;  %v3419_v17 = vld [vmem:[%s5381_s28 + $0x1a1] sm:$0xff]  ;;  %v6544_v15 = vld [vmem:[#allocation9_spill] sm:$0xff] }
  0xdc   : > { %4908 = vmatprep.subr.bf16.mxu0 %v4907_v59  ;;  %v3213_v45 = vld [vmem:[%s5381_s28 + $0xe0] sm:$0xff]  ;;  %v3216_v7 = vld [vmem:[%s5381_s28 + $0x108] sm:$0xff] }
  0xdd   : > { %4145 = vmatmul.mubr.f32.gmra.mrb[22].mxu1 %v5905_v29  ;;  %v3480_v29 = vld [vmem:[%s6483_s1 + $0x460] sm:$0xff] }
  0xde   : > { %4521 = vmatmul.mubr.f32.gmra.mrb[6].mxu0 %v3395_v50  ;;  %4147 = vmatprep.mubr.f32.mxu1 %v5908_v61  ;;  %v4919_v61 = vpack.c.bf16 %v3481_v63, %v3480_v29  ;;  %v3215_v50 = vld [vmem:[%s5381_s28 + $0xf8] sm:$0xff]  ;;  %v3219_v63 = vld [vmem:[%s5381_s28 + $0x128] sm:$0xff] }
  0xdf   : > { %4523 = vmatprep.mubr.f32.mxu0 %v5596_v47  ;;  %4910 = vmatpush3.bf16.msra.mxu0 %v4907_v59  ;;  %v3399_v47 = vld [vmem:[%s5381_s28 + $0xb1] sm:$0xff]  ;;  %v3437_v59 = vld [vmem:[%s5381_s28 + $0x3a] sm:$0xff] }
  0xe0   : > { %4912 = vmatprep.subr.bf16.mxu0 %v4911_v24  ;;  %v3442_v29 = vld [vmem:[%s5381_s28 + $0x7a] sm:$0xff] }
  0xe1   : > { %4148 = vmatmul.mubr.f32.gmra.mrb[24].mxu1 %v5921_v19  ;;  %v3482_v19 = vld [vmem:[%s6483_s1 + $0x470] sm:$0xff] }
  0xe2   : > { %4524 = vmatmul.mubr.f32.gmra.mrb[8].mxu0 %v3397_v12  ;;  %4150 = vmatprep.mubr.f32.mxu1 %v5924_v8  ;;  %v4923_v8 = vpack.c.bf16 %v3483_v14, %v3482_v19  ;;  %v3217_v12 = vld [vmem:[%s5381_s28 + $0x110] sm:$0xff]  ;;  %v3221_v14 = vld [vmem:[%s5381_s28 + $0x140] sm:$0xff] }
  0xe3   : > { %4526 = vmatprep.mubr.f32.mxu0 %v3398_v30  ;;  %4914 = vmatpush3.bf16.msra.mxu0 %v4911_v24  ;;  %v3439_v24 = vld [vmem:[%s5381_s28 + $0x52] sm:$0xff]  ;;  %v3441_v30 = vld [vmem:[%s5381_s28 + $0x6a] sm:$0xff] }
  0xe4   : > { %4916 = vmatprep.subr.bf16.mxu0 %v4915_v60  ;;  %v3444_v19 = vld [vmem:[%s5381_s28 + $0x92] sm:$0xff] }
  0xe5   : > { %4151 = vmatmul.mubr.f32.gmra.mrb[26].mxu1 %v5937_v43  ;;  %v3196_v43 = vld [vmem:[%s5381_s28 + $0x18] sm:$0xff] }
  0xe6   : > { %4527 = vmatmul.mubr.f32.gmra.mrb[10].mxu0 %v3399_v47  ;;  %4153 = vmatprep.mubr.f32.mxu1 %v5940_v20  ;;  %v3199_v20 = vld [vmem:[%s5381_s28 + $0x38] sm:$0xff]  ;;  %v3443_v47 = vld [vmem:[%s5381_s28 + $0x82] sm:$0xff] }
  0xe7   : > { %4529 = vmatprep.mubr.f32.mxu0 %v5652_v6  ;;  %4918 = vmatpush3.bf16.msra.mxu0 %v4915_v60  ;;  %v3197_v6 = vld [vmem:[%s5381_s28 + $0x20] sm:$0xff] }
  0xe8   : > { %4920 = vmatprep.subr.bf16.mxu0 %v4919_v61  ;;  %v3218_v60 = vld [vmem:[%s5381_s28 + $0x120] sm:$0xff] }
  0xe9   : > { %4154 = vmatmul.mubr.f32.gmra.mrb[28].mxu1 %v6537_v36  ;;  %v3222_v36 = vld [vmem:[%s5381_s28 + $0x150] sm:$0xff] }
  0xea   : > { %4530 = vmatmul.mubr.f32.gmra.mrb[12].mxu0 %v5674_v25  ;;  %4156 = vmatprep.mubr.f32.mxu1 %v5956_v33  ;;  %v3198_v25 = vld [vmem:[%s5381_s28 + $0x30] sm:$0xff]  ;;  %v3200_v33 = vld [vmem:[%s5381_s28 + $0x48] sm:$0xff] }
  0xeb   : > { %4532 = vmatprep.mubr.f32.mxu0 %v5994_v58  ;;  %4922 = vmatpush3.bf16.msra.mxu0 %v4919_v61  ;;  %v3220_v61 = vld [vmem:[%s5381_s28 + $0x138] sm:$0xff] }
  0xec   : > { %4924 = vmatprep.subr.bf16.mxu0 %v4923_v8 }
  0xed   : > { %4157 = vmatmul.mubr.f32.gmra.mrb[30].mxu1 %v5969_v31  ;;  %v6538_v31 = vld [vmem:[#allocation3_spill] sm:$0xff] }
  0xee   : > { %4533 = vmatmul.mubr.f32.gmra.mrb[14].mxu0 %v6007_v9  ;;  %4191 = vmatprep.mubr.f32.mxu1 %v3196_v43  ;;  %v3446_v43 = vld [vmem:[%s5381_s28 + $0xaa] sm:$0xff] }
  0xef   : > { %4535 = vmatprep.mubr.f32.mxu0 %v6012_v0  ;;  %4926 = vmatpush3.bf16.msra.mxu0 %v4923_v8  ;;  %v3445_v8 = vld [vmem:[%s5381_s28 + $0x9a] sm:$0xff] }
  0xf1   : > { %4192 = vmatmul.mubr.f32.vlgmr.msra.gmra.mrb[0].mxu1 %v3197_v6  ;;  %v3223_v6 = vld [vmem:[%s5381_s28 + $0x158] sm:$0xff] }
  0xf2   : > { %4536 = vmatmul.mubr.f32.gmra.mrb[16].mxu0 %v6024_v21  ;;  %4935 = vmatpush3.bf16.msra.mxu1 %v6536_v1  ;;  %v6310_v1 = vld [vmem:[%s5381_s28 + $0x189] sm:$0xff] }
  0xf3   : > { %4194 = vmatprep.mubr.f32.mxu1 %v3198_v25  ;;  %4538 = vmatprep.mubr.f32.mxu0 %v6028_v62  ;;  %v3447_v25 = vld [vmem:[%s5381_s28 + $0xb2] sm:$0xff] }
  0xf4   : > { %4928 = vmatprep.subr.bf16.mxu1 %v6538_v31 }
  0xf5   : > { %4195 = vmatmul.mubr.f32.gmra.mrb[2].mxu1 %v3199_v20  ;;  %v3224_v20 = vld [vmem:[%s5381_s28 + $0x168] sm:$0xff] }
  0xf6   : > { %4539 = vmatmul.mubr.f32.gmra.mrb[18].mxu0 %v6040_v34  ;;  %4197 = vmatprep.mubr.f32.mxu1 %v3200_v33  ;;  %v3448_v33 = vld [vmem:[%s5381_s28 + $0xc2] sm:$0xff] }
  0xf7   : > { %4541 = vmatprep.mubr.f32.mxu0 %v6044_v35  ;;  %4936 = vmatpush3.bf16.msra.mxu1 %v6538_v31  ;;  %v3225_v31 = vld [vmem:[%s5381_s28 + $0x170] sm:$0xff] }
  0xf8   : > { %4929 = vmatprep.subr.bf16.mxu1 %v6539_v49 }
  0xf9   : > { %4198 = vmatmul.mubr.f32.gmra.mrb[4].mxu1 %v3201_v51  ;;  %v3449_v51 = vld [vmem:[%s5381_s28 + $0xca] sm:$0xff] }
  0xfa   : > { %4542 = vmatmul.mubr.f32.gmra.mrb[20].mxu0 %v6056_v46  ;;  %4200 = vmatprep.mubr.f32.mxu1 %v3202_v10  ;;  %v3450_v10 = vld [vmem:[%s5381_s28 + $0xda] sm:$0xff] }
  0xfb   : > { %4544 = vmatprep.mubr.f32.mxu0 %v6060_v38  ;;  %4937 = vmatpush3.bf16.msra.mxu1 %v6539_v49  ;;  %v3451_v49 = vld [vmem:[%s5381_s28 + $0xe2] sm:$0xff] }
  0xfc   : > { %4930 = vmatprep.subr.bf16.mxu1 %v6540_v41 }
  0xfd   : > { %4201 = vmatmul.mubr.f32.gmra.mrb[6].mxu1 %v3203_v4  ;;  %v3452_v4 = vld [vmem:[%s5381_s28 + $0xf2] sm:$0xff] }
  0xfe   : > { %4545 = vmatmul.mubr.f32.gmra.mrb[22].mxu0 %v6072_v57  ;;  %4203 = vmatprep.mubr.f32.mxu1 %v3204_v18  ;;  %v3453_v18 = vld [vmem:[%s5381_s28 + $0xfa] sm:$0xff] }
  0xff   : > { %4547 = vmatprep.mubr.f32.mxu0 %v6076_v16  ;;  %4938 = vmatpush3.bf16.msra.mxu1 %v6540_v41  ;;  %v3454_v41 = vld [vmem:[%s5381_s28 + $0x10a] sm:$0xff] }
 0x100   : > { %4931 = vmatprep.subr.bf16.mxu1 %v6541_v53 }
 0x101   : > { %4204 = vmatmul.mubr.f32.gmra.mrb[8].mxu1 %v3205_v22  ;;  %v3456_v22 = vld [vmem:[%s5381_s28 + $0x122] sm:$0xff] }
 0x102   : > { %4548 = vmatmul.mubr.f32.gmra.mrb[24].mxu0 %v6088_v5  ;;  %4206 = vmatprep.mubr.f32.mxu1 %v3206_v39 }
 0x103   : > { %4550 = vmatprep.mubr.f32.mxu0 %v6092_v28  ;;  %4939 = vmatpush3.bf16.msra.mxu1 %v6541_v53 }
 0x104   : > { %4932 = vmatprep.subr.bf16.mxu1 %v6542_v52 }
 0x105   : > { %4207 = vmatmul.mubr.f32.gmra.mrb[10].mxu1 %v3207_v42 }
 0x106   : > { %4551 = vmatmul.mubr.f32.gmra.mrb[26].mxu0 %v6104_v26  ;;  %4209 = vmatprep.mubr.f32.mxu1 %v3208_v23 }
 0x107   : > { %4553 = vmatprep.mubr.f32.mxu0 %v6303_v56  ;;  %4940 = vmatpush3.bf16.msra.mxu1 %v6542_v52 }
 0x108   : > { %4933 = vmatprep.subr.bf16.mxu1 %v6543_v2 }
 0x109   : > { %4210 = vmatmul.mubr.f32.gmra.mrb[12].mxu1 %v3209_v55 }
 0x10a   : > { %4554 = vmatmul.mubr.f32.gmra.mrb[28].mxu0 %v6310_v1  ;;  %4212 = vmatprep.mubr.f32.mxu1 %v3210_v27 }
 0x10b   : > { %4556 = vmatprep.mubr.f32.mxu0 %v3418_v40  ;;  %4941 = vmatpush3.bf16.msra.mxu1 %v6543_v2 }
 0x10c   : > { %4934 = vmatprep.subr.bf16.mxu1 %v6544_v15 }
 0x10d   : > { %4213 = vmatmul.mubr.f32.gmra.mrb[14].mxu1 %v3211_v44 }
 0x10e   : > { %4557 = vmatmul.mubr.f32.gmra.mrb[30].mxu0 %v3419_v17  ;;  %4215 = vmatprep.mubr.f32.mxu1 %v3212_v54 }
 0x10f   : > { %4591 = vmatprep.mubr.f32.mxu0 %v3436_v11  ;;  %4942 = vmatpush3.bf16.msra.mxu1 %v6544_v15 }
 0x111   : > { %4216 = vmatmul.mubr.f32.gmra.mrb[16].mxu1 %v3213_v45 }
 0x112   : > { %4592 = vmatmul.mubr.f32.vlgmr.msra.gmra.mrb[0].mxu0 %v3437_v59  ;;  %4218 = vmatprep.mubr.f32.mxu1 %v3214_v37 }
 0x113   : > { %4594 = vmatprep.mubr.f32.mxu0 %v3438_v3 }
 0x115   : > { %4219 = vmatmul.mubr.f32.gmra.mrb[18].mxu1 %v3215_v50 }
 0x116   : > { %4595 = vmatmul.mubr.f32.gmra.mrb[2].mxu0 %v3439_v24  ;;  %4221 = vmatprep.mubr.f32.mxu1 %v3216_v7 }
 0x117   : > { %4597 = vmatprep.mubr.f32.mxu0 %v3440_v13 }
 0x119   : > { %4222 = vmatmul.mubr.f32.gmra.mrb[20].mxu1 %v3217_v12 }
 0x11a   : > { %4598 = vmatmul.mubr.f32.gmra.mrb[4].mxu0 %v3441_v30  ;;  %4224 = vmatprep.mubr.f32.mxu1 %v3218_v60 }
 0x11b   : > { %4600 = vmatprep.mubr.f32.mxu0 %v3442_v29 }
 0x11d   : > { %4225 = vmatmul.mubr.f32.gmra.mrb[22].mxu1 %v3219_v63 }
 0x11e   : > { %4601 = vmatmul.mubr.f32.gmra.mrb[6].mxu0 %v3443_v47  ;;  %4227 = vmatprep.mubr.f32.mxu1 %v3220_v61 }
 0x11f   : > { %4603 = vmatprep.mubr.f32.mxu0 %v3444_v19 }
 0x121   : > { %4228 = vmatmul.mubr.f32.gmra.mrb[24].mxu1 %v3221_v14 }
 0x122   : > { %4604 = vmatmul.mubr.f32.gmra.mrb[8].mxu0 %v3445_v8  ;;  %4230 = vmatprep.mubr.f32.mxu1 %v3222_v36 }
 0x123   : > { %4606 = vmatprep.mubr.f32.mxu0 %v3446_v43 }
 0x125   : > { %4231 = vmatmul.mubr.f32.gmra.mrb[26].mxu1 %v3223_v6 }
 0x126   : > { %4607 = vmatmul.mubr.f32.gmra.mrb[10].mxu0 %v3447_v25  ;;  %4233 = vmatprep.mubr.f32.mxu1 %v3224_v20 }
 0x127   : > { %4609 = vmatprep.mubr.f32.mxu0 %v3448_v33 }
 0x129   : > { %4234 = vmatmul.mubr.f32.gmra.mrb[28].mxu1 %v3225_v31 }
 0x12a   : > { %4610 = vmatmul.mubr.f32.gmra.mrb[12].mxu0 %v3449_v51  ;;  %4236 = vmatprep.mubr.f32.mxu1 %v6172_v32  ;;  %v3455_v32 = vld [vmem:[%s5381_s28 + $0x112] sm:$0xff] }
 0x12b   : > { %4612 = vmatprep.mubr.f32.mxu0 %v3450_v10 }
 0x12d   : > { %4237 = vmatmul.mubr.f32.gmra.mrb[30].mxu1 %v6185_v48  ;;  %v3458_v48 = vld [vmem:[%s5381_s28 + $0x13a] sm:$0xff] }
 0x12e   : > { %4613 = vmatmul.mubr.f32.gmra.mrb[14].mxu0 %v3451_v49  ;;  %4295 = vmatprep.mubr.f32.mxu1 %v5994_v58  ;;  %v3457_v58 = vld [vmem:[%s5381_s28 + $0x12a] sm:$0xff] }
 0x12f   : > { %4615 = vmatprep.mubr.f32.mxu0 %v3452_v4 }
 0x131   : > { %4296 = vmatmul.mubr.f32.vlgmr.msra.gmra.mrb[16].mxu1 %v6007_v9  ;;  %v3459_v9 = vld [vmem:[%s5381_s28 + $0x142] sm:$0xff] }
 0x132   : > { %4616 = vmatmul.mubr.f32.gmra.mrb[16].mxu0 %v3453_v18  ;;  %4298 = vmatprep.mubr.f32.mxu1 %v6012_v0  ;;  %v3460_v0 = vld [vmem:[%s5381_s28 + $0x152] sm:$0xff] }
 0x133   : > { %4618 = vmatprep.mubr.f32.mxu0 %v3454_v41 }
 0x135   : > { %4299 = vmatmul.mubr.f32.gmra.mrb[18].mxu1 %v6024_v21  ;;  %v3461_v21 = vld [vmem:[%s5381_s28 + $0x15a] sm:$0xff] }
 0x136   : > { %4619 = vmatmul.mubr.f32.gmra.mrb[18].mxu0 %v3455_v32  ;;  %4301 = vmatprep.mubr.f32.mxu1 %v6028_v62  ;;  %v3462_v62 = vld [vmem:[%s5381_s28 + $0x16a] sm:$0xff] }
 0x137   : > { %4621 = vmatprep.mubr.f32.mxu0 %v3456_v22 }
 0x139   : > { %4302 = vmatmul.mubr.f32.gmra.mrb[20].mxu1 %v6040_v34  ;;  %v3463_v34 = vld [vmem:[%s5381_s28 + $0x172] sm:$0xff] }
 0x13a   : > { %4622 = vmatmul.mubr.f32.gmra.mrb[20].mxu0 %v3457_v58  ;;  %4304 = vmatprep.mubr.f32.mxu1 %v6044_v35  ;;  %v3464_v35 = vld [vmem:[%s5381_s28 + $0x182] sm:$0xff] }
 0x13b   : > { %4624 = vmatprep.mubr.f32.mxu0 %v3458_v48 }
 0x13d   : > { %4305 = vmatmul.mubr.f32.gmra.mrb[22].mxu1 %v6056_v46  ;;  %v3465_v46 = vld [vmem:[%s5381_s28 + $0x18a] sm:$0xff] }
 0x13e   : > { %4625 = vmatmul.mubr.f32.gmra.mrb[22].mxu0 %v3459_v9  ;;  %4307 = vmatprep.mubr.f32.mxu1 %v6060_v38  ;;  %v3466_v38 = vld [vmem:[%s5381_s28 + $0x19a] sm:$0xff] }
 0x13f   : > { %4627 = vmatprep.mubr.f32.mxu0 %v3460_v0 }
 0x141   : > { %4308 = vmatmul.mubr.f32.gmra.mrb[24].mxu1 %v6072_v57  ;;  %v3467_v57 = vld [vmem:[%s5381_s28 + $0x1a2] sm:$0xff] }
 0x142   : > { %4628 = vmatmul.mubr.f32.gmra.mrb[24].mxu0 %v3461_v21  ;;  %4310 = vmatprep.mubr.f32.mxu1 %v6076_v16 }
 0x143   : > { %4630 = vmatprep.mubr.f32.mxu0 %v3462_v62 }
 0x145   : > { %4311 = vmatmul.mubr.f32.gmra.mrb[26].mxu1 %v6088_v5 }
 0x146   : > { %4631 = vmatmul.mubr.f32.gmra.mrb[26].mxu0 %v3463_v34  ;;  %4313 = vmatprep.mubr.f32.mxu1 %v6092_v28 }
 0x147   : > { %4633 = vmatprep.mubr.f32.mxu0 %v3464_v35 }
 0x149   : > { %4314 = vmatmul.mubr.f32.gmra.mrb[28].mxu1 %v6104_v26 }
 0x14a   : > { %4634 = vmatmul.mubr.f32.gmra.mrb[28].mxu0 %v3465_v46  ;;  %4316 = vmatprep.mubr.f32.mxu1 %v6303_v56 }
 0x14b   : > { %4636 = vmatprep.mubr.f32.mxu0 %v3466_v38 }
 0x14d   : > { %4317 = vmatmul.mubr.f32.gmra.mrb[30].mxu1 %v6310_v1  ;;  %v6395_v1 = vld [vmem:[%s6484_s2] ss:$0 sm:$0xff] }
 0x14e   : > { %4637 = vmatmul.mubr.f32.gmra.mrb[30].mxu0 %v3467_v57 }
 0x1c4   : > { %v4193_v16 = vpop.f32.mrb[0].mxu1 }
 0x1c5   : > { %v1262_v39 = vpop.f32.mrb[1].mxu1  ;;  %v4943_v54 = vadd.f32 %v4193_v16, %v6395_v1 }
 0x1c6   : > { %v4945_v11 = vadd.f32 %v6395_v1, %v1262_v39 }
 0x1c8   : > { %v4196_v53 = vpop.f32.mrb[2].mxu1 }
 0x1c9   : > { %v1272_v5 = vpop.f32.mrb[3].mxu1  ;;  %v4947_v3 = vadd.f32 %v4196_v53, %v6395_v1 }
 0x1ca   : > { %v4949_v24 = vadd.f32 %v6395_v1, %v1272_v5 }
 0x1cc   : > { %v4199_v42 = vpop.f32.mrb[4].mxu1 }
 0x1cd   : > { %v1282_v28 = vpop.f32.mrb[5].mxu1  ;;  %v4951_v29 = vadd.f32 %v4199_v42, %v6395_v1 }
 0x1ce   : > { %v4953_v47 = vadd.f32 %v6395_v1, %v1282_v28 }
 0x1d0   : > { %v4202_v23 = vpop.f32.mrb[6].mxu1 }
 0x1d1   : > { %v1292_v52 = vpop.f32.mrb[7].mxu1  ;;  %v4955_v43 = vadd.f32 %v4202_v23, %v6395_v1 }
 0x1d2   : > { %v4957_v25 = vadd.f32 %v6395_v1, %v1292_v52 }
 0x1d4   : > { %v4205_v55 = vpop.f32.mrb[8].mxu1 }
 0x1d5   : > { %v1302_v27 = vpop.f32.mrb[9].mxu1  ;;  %v4959_v49 = vadd.f32 %v4205_v55, %v6395_v1 }
 0x1d6   : > { %v4961_v18 = vadd.f32 %v6395_v1, %v1302_v27 }
 0x1d8   : > { %v4208_v26 = vpop.f32.mrb[10].mxu1 }
 0x1d9   : > { %v1312_v40 = vpop.f32.mrb[11].mxu1  ;;  %v4963_v9 = vadd.f32 %v4208_v26, %v6395_v1 }
 0x1da   : > { %v4965_v21 = vadd.f32 %v6395_v1, %v1312_v40 }
 0x1dc   : > { %v6386_v2 = vpop.f32.mrb[12].mxu1 }
 0x1dd   : > { %v6388_v56 = vpop.f32.mrb[13].mxu1  ;;  %v4967_v57 = vadd.f32 %v6386_v2, %v6395_v1 }
 0x1de   : > { %v4969_v39 = vadd.f32 %v6395_v1, %v6388_v56 }
 0x1e0   : > { %v6390_v44 = vpop.f32.mrb[14].mxu1 }
 0x1e1   : > { %v6397_v17 = vpop.f32.mrb[15].mxu1  ;;  %v4971_v52 = vadd.f32 %v6390_v44, %v6395_v1 }
 0x1e2   : > { %v4973_v27 = vadd.f32 %v6395_v1, %v6397_v17 }
 0x1e5   : > { %v4593_v15 = vpop.f32.mrb[0].mxu0 }
 0x1e6   : > { %v4944_v45 = vadd.f32 %v4943_v54, %v4593_v15  ;;  %v2793_v59 = vpop.f32.mrb[1].mxu0 }
 0x1e7   : > { %v4946_v37 = vadd.f32 %v4945_v11, %v2793_v59 }
 0x1e8   : > { %v2985_v50 = vmax.f32 %v4944_v45, 0.0 }
 0x1e9   : > { %v2984_v7 = vmax.f32 %v4946_v37, 0.0  ;;  %v4596_v13 = vpop.f32.mrb[2].mxu0 }
 0x1ea   : > { %3017 = vst [vmem:[%s6405_s24 + $0x8] sm:$0xff] %v2985_v50  ;;  %v4948_v12 = vadd.f32 %v4947_v3, %v4596_v13  ;;  %v2803_v30 = vpop.f32.mrb[3].mxu0 }
 0x1eb   : > { %3016 = vst [vmem:[%s6405_s24] sm:$0xff] %v2984_v7  ;;  %v4950_v60 = vadd.f32 %v4949_v24, %v2803_v30 }
 0x1ec   : > { %v2987_v63 = vmax.f32 %v4948_v12, 0.0 }
 0x1ed   : > { %v2986_v61 = vmax.f32 %v4950_v60, 0.0  ;;  %v4599_v19 = vpop.f32.mrb[4].mxu0 }
 0x1ee   : > { %3019 = vst [vmem:[%s6405_s24 + $0x18] sm:$0xff] %v2987_v63  ;;  %v4952_v14 = vadd.f32 %v4951_v29, %v4599_v19  ;;  %v2813_v8 = vpop.f32.mrb[5].mxu0 }
 0x1ef   : > { %3018 = vst [vmem:[%s6405_s24 + $0x10] sm:$0xff] %v2986_v61  ;;  %v4954_v36 = vadd.f32 %v4953_v47, %v2813_v8 }
 0x1f0   : > { %v2989_v6 = vmax.f32 %v4952_v14, 0.0 }
 0x1f1   : > { %v2988_v20 = vmax.f32 %v4954_v36, 0.0  ;;  %v4602_v33 = vpop.f32.mrb[6].mxu0 }
 0x1f2   : > { %3021 = vst [vmem:[%s6405_s24 + $0x28] sm:$0xff] %v2989_v6  ;;  %v4956_v31 = vadd.f32 %v4955_v43, %v4602_v33  ;;  %v2823_v51 = vpop.f32.mrb[7].mxu0 }
 0x1f3   : > { %3020 = vst [vmem:[%s6405_s24 + $0x20] sm:$0xff] %v2988_v20  ;;  %v4958_v10 = vadd.f32 %v4957_v25, %v2823_v51 }
 0x1f4   : > { %v2991_v4 = vmax.f32 %v4956_v31, 0.0 }
 0x1f5   : > { %v2990_v41 = vmax.f32 %v4958_v10, 0.0  ;;  %v4605_v32 = vpop.f32.mrb[8].mxu0 }
 0x1f6   : > { %3023 = vst [vmem:[%s6405_s24 + $0x38] sm:$0xff] %v2991_v4  ;;  %v4960_v22 = vadd.f32 %v4959_v49, %v4605_v32  ;;  %v2833_v58 = vpop.f32.mrb[9].mxu0 }
 0x1f7   : > { %3022 = vst [vmem:[%s6405_s24 + $0x30] sm:$0xff] %v2990_v41  ;;  %v4962_v48 = vadd.f32 %v4961_v18, %v2833_v58 }
 0x1f8   : > { %v2993_v0 = vmax.f32 %v4960_v22, 0.0 }
 0x1f9   : > { %v2992_v62 = vmax.f32 %v4962_v48, 0.0  ;;  %v4608_v34 = vpop.f32.mrb[10].mxu0 }
 0x1fa   : > { %3025 = vst [vmem:[%s6405_s24 + $0x48] sm:$0xff] %v2993_v0  ;;  %v4964_v35 = vadd.f32 %v4963_v9, %v4608_v34  ;;  %v2843_v46 = vpop.f32.mrb[11].mxu0 }
 0x1fb   : > { %3024 = vst [vmem:[%s6405_s24 + $0x40] sm:$0xff] %v2992_v62  ;;  %v4966_v38 = vadd.f32 %v4965_v21, %v2843_v46 }
 0x1fc   : > { %v2995_v16 = vmax.f32 %v4964_v35, 0.0 }
 0x1fd   : > { %v2994_v53 = vmax.f32 %v4966_v38, 0.0  ;;  %v4611_v5 = vpop.f32.mrb[12].mxu0 }
 0x1fe   : > { %3027 = vst [vmem:[%s6405_s24 + $0x58] sm:$0xff] %v2995_v16  ;;  %v4968_v42 = vadd.f32 %v4967_v57, %v4611_v5  ;;  %v2853_v28 = vpop.f32.mrb[13].mxu0 }
 0x1ff   : > { %3026 = vst [vmem:[%s6405_s24 + $0x50] sm:$0xff] %v2994_v53  ;;  %v4970_v23 = vadd.f32 %v4969_v39, %v2853_v28 }
 0x200   : > { %v2997_v55 = vmax.f32 %v4968_v42, 0.0 }
 0x201   : > { %v2996_v26 = vmax.f32 %v4970_v23, 0.0  ;;  %v4614_v40 = vpop.f32.mrb[14].mxu0 }
 0x202   : > { %3029 = vst [vmem:[%s6405_s24 + $0x68] sm:$0xff] %v2997_v55  ;;  %v4972_v2 = vadd.f32 %v4971_v52, %v4614_v40  ;;  %v2863_v56 = vpop.f32.mrb[15].mxu0 }
 0x203   : > { %3028 = vst [vmem:[%s6405_s24 + $0x60] sm:$0xff] %v2996_v26  ;;  %v4974_v54 = vadd.f32 %v4973_v27, %v2863_v56 }
 0x204   : > { %v2999_v11 = vmax.f32 %v4972_v2, 0.0  ;;  %v4297_v15 = vpop.f32.mrb[16].mxu1 }
 0x205   : > { %v2998_v45 = vmax.f32 %v4974_v54, 0.0  ;;  %v4975_v59 = vadd.f32 %v4297_v15, %v6395_v1  ;;  %v4617_v37 = vpop.f32.mrb[16].mxu0  ;;  %v1648_v44 = vpop.f32.mrb[17].mxu1 }
 0x206   : > { %3031 = vst [vmem:[%s6405_s24 + $0x78] sm:$0xff] %v2999_v11  ;;  %v4977_v17 = vadd.f32 %v6395_v1, %v1648_v44  ;;  %v2873_v3 = vpop.f32.mrb[17].mxu0 }
 0x207   : > { %3030 = vst [vmem:[%s6405_s24 + $0x70] sm:$0xff] %v2998_v45  ;;  %v4976_v50 = vadd.f32 %v4975_v59, %v4617_v37 }
 0x208   : > { %v4978_v24 = vadd.f32 %v4977_v17, %v2873_v3  ;;  %v4300_v7 = vpop.f32.mrb[18].mxu1 }
 0x209   : > { %v3001_v13 = vmax.f32 %v4976_v50, 0.0  ;;  %v4979_v12 = vadd.f32 %v4300_v7, %v6395_v1  ;;  %v4620_v30 = vpop.f32.mrb[18].mxu0  ;;  %v1658_v60 = vpop.f32.mrb[19].mxu1 }
 0x20a   : > { %v3000_v29 = vmax.f32 %v4978_v24, 0.0  ;;  %v4981_v63 = vadd.f32 %v6395_v1, %v1658_v60  ;;  %v2883_v47 = vpop.f32.mrb[19].mxu0 }
 0x20b   : > { %3033 = vst [vmem:[%s6405_s24 + $0x88] sm:$0xff] %v3001_v13  ;;  %v4980_v61 = vadd.f32 %v4979_v12, %v4620_v30 }
 0x20c   : > { %3032 = vst [vmem:[%s6405_s24 + $0x80] sm:$0xff] %v3000_v29  ;;  %v4982_v19 = vadd.f32 %v4981_v63, %v2883_v47  ;;  %v4303_v14 = vpop.f32.mrb[20].mxu1 }
 0x20d   : > { %v3003_v8 = vmax.f32 %v4980_v61, 0.0  ;;  %v4983_v36 = vadd.f32 %v4303_v14, %v6395_v1  ;;  %v4623_v43 = vpop.f32.mrb[20].mxu0  ;;  %v1668_v6 = vpop.f32.mrb[21].mxu1 }
 0x20e   : > { %v3002_v25 = vmax.f32 %v4982_v19, 0.0  ;;  %v4985_v20 = vadd.f32 %v6395_v1, %v1668_v6  ;;  %v2893_v33 = vpop.f32.mrb[21].mxu0 }
 0x20f   : > { %3035 = vst [vmem:[%s6405_s24 + $0x98] sm:$0xff] %v3003_v8  ;;  %v4984_v31 = vadd.f32 %v4983_v36, %v4623_v43 }
 0x210   : > { %3034 = vst [vmem:[%s6405_s24 + $0x90] sm:$0xff] %v3002_v25  ;;  %v4986_v51 = vadd.f32 %v4985_v20, %v2893_v33  ;;  %v4306_v10 = vpop.f32.mrb[22].mxu1 }
 0x211   : > { %v3005_v49 = vmax.f32 %v4984_v31, 0.0  ;;  %v4987_v4 = vadd.f32 %v4306_v10, %v6395_v1  ;;  %v4626_v18 = vpop.f32.mrb[22].mxu0  ;;  %v1678_v41 = vpop.f32.mrb[23].mxu1 }
 0x212   : > { %v3004_v32 = vmax.f32 %v4986_v51, 0.0  ;;  %v4989_v22 = vadd.f32 %v6395_v1, %v1678_v41  ;;  %v2903_v58 = vpop.f32.mrb[23].mxu0 }
 0x213   : > { %3037 = vst [vmem:[%s6405_s24 + $0xa8] sm:$0xff] %v3005_v49  ;;  %v4988_v48 = vadd.f32 %v4987_v4, %v4626_v18 }
 0x214   : > { %3036 = vst [vmem:[%s6405_s24 + $0xa0] sm:$0xff] %v3004_v32  ;;  %v4990_v9 = vadd.f32 %v4989_v22, %v2903_v58  ;;  %v4309_v0 = vpop.f32.mrb[24].mxu1 }
 0x215   : > { %v3007_v21 = vmax.f32 %v4988_v48, 0.0  ;;  %v4991_v62 = vadd.f32 %v4309_v0, %v6395_v1  ;;  %v4629_v34 = vpop.f32.mrb[24].mxu0  ;;  %v1688_v35 = vpop.f32.mrb[25].mxu1 }
 0x216   : > { %v3006_v46 = vmax.f32 %v4990_v9, 0.0  ;;  %v4993_v38 = vadd.f32 %v6395_v1, %v1688_v35  ;;  %v2913_v57 = vpop.f32.mrb[25].mxu0 }
 0x217   : > { %3039 = vst [vmem:[%s6405_s24 + $0xb8] sm:$0xff] %v3007_v21  ;;  %v4992_v16 = vadd.f32 %v4991_v62, %v4629_v34 }
 0x218   : > { %3038 = vst [vmem:[%s6405_s24 + $0xb0] sm:$0xff] %v3006_v46  ;;  %v4994_v39 = vadd.f32 %v4993_v38, %v2913_v57  ;;  %v4312_v53 = vpop.f32.mrb[26].mxu1 }
 0x219   : > { %v3009_v5 = vmax.f32 %v4992_v16, 0.0  ;;  %v4995_v42 = vadd.f32 %v4312_v53, %v6395_v1  ;;  %v4632_v28 = vpop.f32.mrb[26].mxu0  ;;  %v1698_v23 = vpop.f32.mrb[27].mxu1 }
 0x21a   : > { %v3008_v52 = vmax.f32 %v4994_v39, 0.0  ;;  %v4997_v55 = vadd.f32 %v6395_v1, %v1698_v23  ;;  %v2923_v27 = vpop.f32.mrb[27].mxu0 }
 0x21b   : > { %3041 = vst [vmem:[%s6405_s24 + $0xc8] sm:$0xff] %v3009_v5  ;;  %v4996_v26 = vadd.f32 %v4995_v42, %v4632_v28 }
 0x21c   : > { %3040 = vst [vmem:[%s6405_s24 + $0xc0] sm:$0xff] %v3008_v52  ;;  %v4998_v40 = vadd.f32 %v4997_v55, %v2923_v27  ;;  %v4315_v2 = vpop.f32.mrb[28].mxu1 }
 0x21d   : > { %v3011_v56 = vmax.f32 %v4996_v26, 0.0  ;;  %v4999_v54 = vadd.f32 %v4315_v2, %v6395_v1  ;;  %v4635_v11 = vpop.f32.mrb[28].mxu0  ;;  %v1708_v15 = vpop.f32.mrb[29].mxu1 }
 0x21e   : > { %v3010_v45 = vmax.f32 %v4998_v40, 0.0  ;;  %v5001_v59 = vadd.f32 %v6395_v1, %v1708_v15  ;;  %v2933_v37 = vpop.f32.mrb[29].mxu0 }
 0x21f   : > { %3043 = vst [vmem:[%s6405_s24 + $0xd8] sm:$0xff] %v3011_v56  ;;  %v5000_v44 = vadd.f32 %v4999_v54, %v4635_v11 }
 0x220   : > { %3042 = vst [vmem:[%s6405_s24 + $0xd0] sm:$0xff] %v3010_v45  ;;  %v5002_v17 = vadd.f32 %v5001_v59, %v2933_v37  ;;  %v4318_v3 = vpop.f32.mrb[30].mxu1 }
 0x221   : > { %v3013_v50 = vmax.f32 %v5000_v44, 0.0  ;;  %v5003_v24 = vadd.f32 %v4318_v3, %v6395_v1  ;;  %v4638_v7 = vpop.f32.mrb[30].mxu0  ;;  %v1718_v13 = vpop.f32.mrb[31].mxu1 }
 0x222   : > { %v3012_v12 = vmax.f32 %v5002_v17, 0.0  ;;  %v5005_v30 = vadd.f32 %v6395_v1, %v1718_v13  ;;  %v2943_v60 = vpop.f32.mrb[31].mxu0 }
 0x223   : > { %3045 = vst [vmem:[%s6405_s24 + $0xe8] sm:$0xff] %v3013_v50  ;;  %v5004_v29 = vadd.f32 %v5003_v24, %v4638_v7 }
 0x224   : > { %3044 = vst [vmem:[%s6405_s24 + $0xe0] sm:$0xff] %v3012_v12  ;;  %v5006_v63 = vadd.f32 %v5005_v30, %v2943_v60 }
 0x225   : > { %v3015_v47 = vmax.f32 %v5004_v29, 0.0 }
 0x226   : > { %v3014_v61 = vmax.f32 %v5006_v63, 0.0 }
 0x227   : > { %3047 = vst [vmem:[%s6405_s24 + $0xf8] sm:$0xff] %v3015_v47 }
 0x228   : > { %3046 = vst [vmem:[%s6405_s24 + $0xf0] sm:$0xff] %v3014_v61 }
 0x229 PF: > { %s13_s14 = sadd.s32 1, %s5278_s14   ;;  %s6545_s12 = smov %s5274_s13 }
 0x22a   : > { %p10_p5 = scmp.ge.s32.totalorder %s13_s14, 4   ;;  %s6546_s13 = smov %s6548_s15 }
 0x22c   :  { %12 = sbr.rel (!%p10_p5) target bundleno = 2 (0x2), region = 78 }

</bundles_post_ra>
